<compile_context>
chip_gen: v7x
topology: tpu7x:2x2x1
jax: 0.10.0
libtpu: 0.0.40
codegen_flags: <defaults>
</compile_context>

<pallas_src>
import functools

import jax
import jax.numpy as jnp
from jax.experimental import pallas as pl
from jax.experimental.pallas import tpu as pltpu


COUNT_BITWIDTH = 138  # fixed output width from MLPb.__init__
LANE = 128
MAX_TILE_ROWS = 1024  # per perf review: 512-1024 tiles already hit ~85% roofline


def _round_up(v, m):
    return ((v + m - 1) // m) * m


def _layer_dims(input_size):
    # [in, hidden1, hidden2, hidden3, hidden4, out] per MLPb.__init__
    return [input_size, input_size // 2, input_size // 3, 300, 200, COUNT_BITWIDTH]


def _auto_block_batch(batch):
    """1 tile on single-TC chips (v5e/v6e), >=2 tiles on v7x (2 TCs/chip)."""
    kind = ""
    try:
        kind = jax.devices()[0].device_kind.lower()
    except Exception:  # pragma: no cover - defensive, never expected on TPU
        pass
    n_tc = 2 if ("v7" in kind or "7x" in kind) else 1
    per_tile = -(-batch // n_tc)                     # ceil(batch / n_tc)
    per_tile = min(max(per_tile, 8), MAX_TILE_ROWS)  # sublane-aligned, capped
    return _round_up(per_tile, 8)


def init_params(key, input_size):
    """Deterministic init matching torch.nn.Linear defaults.
    W stored in torch layout (out, in); b stored (out,)."""
    dims = _layer_dims(input_size)
    params = {}
    for i in range(1, 6):
        in_d, out_d = dims[i - 1], dims[i]
        key, kw, kb = jax.random.split(key, 3)
        bound = float(in_d) ** -0.5
        params[f"w{i}"] = jax.random.uniform(kw, (out_d, in_d), jnp.float32, -bound, bound)
        params[f"b{i}"] = jax.random.uniform(kb, (out_d,), jnp.float32, -bound, bound)
    return params


def prepare_params(raw, input_size):
    """Pack all 5 layers into two slabs:
      w slab: (sum(in_pad), max(out_pad)) bf16, each layer's W^T at a
              row offset that is a multiple of 128, zero padded elsewhere.
      b slab: (1, sum(out_pad)) f32, each bias at a 128-aligned lane offset.
    Zero padding of K/N dims is mathematically inert."""
    dims = _layer_dims(input_size)
    in_pad = [_round_up(d, LANE) for d in dims[:-1]]
    out_pad = [_round_up(d, LANE) for d in dims[1:]]
    w_slab = jnp.zeros((sum(in_pad), max(out_pad)), jnp.float32)
    b_slab = jnp.zeros((1, sum(out_pad)), jnp.float32)
    r = c = 0
    for i in range(5):
        w = raw[f"w{i + 1}"]          # (out, in) torch layout
        b = raw[f"b{i + 1}"]          # (out,)
        out_d, in_d = w.shape
        w_slab = w_slab.at[r:r + in_d, :out_d].set(w.T)
        b_slab = b_slab.at[0, c:c + out_d].set(b)
        r += in_pad[i]
        c += out_pad[i]
    return {"w": w_slab.astype(jnp.bfloat16), "b": b_slab}


@functools.partial(jax.jit, static_argnames=("input_size", "block_batch"))
def _mlpb_forward_jit(x, w_slab, b_slab, *, input_size, block_batch):
    dims = _layer_dims(input_size)
    in_pad = [_round_up(d, LANE) for d in dims[:-1]]
    out_pad = [_round_up(d, LANE) for d in dims[1:]]
    # Static slab offsets (row offsets multiples of 128, lane offsets multiples of 128).
    row_off = [0]
    for p in in_pad[:-1]:
        row_off.append(row_off[-1] + p)
    col_off = [0]
    for p in out_pad[:-1]:
        col_off.append(col_off[-1] + p)

    batch = x.shape[0]
    b_pad = _round_up(batch, block_batch)
    if b_pad != batch:
        x = jnp.pad(x, ((0, b_pad - batch), (0, 0)))   # only when needed

    def kernel(x_ref, w_ref, b_ref, out_ref):
        # Layer 1 consumes the raw (unpadded) input features: only the first
        # `input_size` rows of its packed weight block are used, so x needs
        # no lane padding.  bf16 MXU operands, f32 accumulate + bias/ReLU.
        h = x_ref[...].astype(jnp.bfloat16)
        k = input_size
        for layer in range(5):
            w = w_ref[row_off[layer]:row_off[layer] + k, 0:out_pad[layer]]
            b = b_ref[:, col_off[layer]:col_off[layer] + out_pad[layer]]
            h = jnp.dot(h, w, preferred_element_type=jnp.float32) + b
            if layer < 4:
                h = jnp.maximum(h, 0.0).astype(jnp.bfloat16)
            k = out_pad[layer]
        out_ref[...] = h.astype(out_ref.dtype)

    const_spec = lambda arr: pl.BlockSpec(arr.shape, lambda i: (0,) * arr.ndim)

    out_padded = pl.pallas_call(
        kernel,
        out_shape=jax.ShapeDtypeStruct((b_pad, out_pad[-1]), jnp.float32),
        grid=(b_pad // block_batch,),
        in_specs=[
            # last dim == full array dim, so 96 (< 128) is allowed here.
            pl.BlockSpec((block_batch, input_size), lambda i: (i, 0)),
            const_spec(w_slab),   # VMEM-resident, DMA'd once across the grid
            const_spec(b_slab),
        ],
        out_specs=pl.BlockSpec((block_batch, out_pad[-1]), lambda i: (i, 0)),
        compiler_params=pltpu.CompilerParams(
            dimension_semantics=("parallel",),  # shards batch tiles across TCs on v7x
        ),
    )(x, w_slab, b_slab)

    # Drop batch padding and the 138 -> 256 lane padding of the logits.
    return out_padded[:batch, :COUNT_BITWIDTH]


def mlpb_forward(x, prepped, *, input_size, block_batch=None):
    """x: (batch, input_size) float32.  prepped: output of prepare_params."""
    if block_batch is None:
        block_batch = _auto_block_batch(x.shape[0])
    return _mlpb_forward_jit(x, prepped["w"], prepped["b"],
                             input_size=input_size, block_batch=block_batch)


def mlpb_reference(x, raw):
    h = x
    for i in range(1, 5):
        h = jnp.maximum(h @ raw[f"w{i}"].T + raw[f"b{i}"], 0.0)
    return h @ raw["w5"].T + raw["b5"]


if __name__ == "__main__":
    key = jax.random.PRNGKey(0)
    k_x, k_p = jax.random.split(key)

    # input_size divisible by 2 and 3 -> hidden widths 48 / 32, as in the module.
    batch, input_size = 256, 96
    x = jax.random.normal(k_x, (batch, input_size), jnp.float32)

    raw_params = init_params(k_p, input_size)
    prepped = prepare_params(raw_params, input_size)

    out = mlpb_forward(x, prepped, input_size=input_size)
    out = jax.block_until_ready(out)

    ref = mlpb_reference(x, raw_params)
    assert out.shape == (batch, COUNT_BITWIDTH), out.shape
    max_err = float(jnp.max(jnp.abs(out - ref)))
    # bf16 matmul operands (f32 accumulation) vs pure-f32 reference -> loosened tolerance.
    assert max_err < 5e-2, f"mismatch vs reference, max abs err = {max_err}"

    print("KERNEL_OK")
</pallas_src>

<mosaic_0001>
module attributes {stable_mosaic.version = 11 : i64} {
  func.func @kernel(%arg0: i32, %arg1: memref<256x96xf32, #tpu.memory_space<vmem>>, %arg2: memref<1024x384xbf16, #tpu.memory_space<vmem>>, %arg3: memref<1x1152xf32, #tpu.memory_space<vmem>>, %arg4: memref<256x256xf32, #tpu.memory_space<vmem>>) attributes {dimension_semantics = [#tpu.dimension_semantics<parallel>], iteration_bounds = array<i64: 1>, scalar_prefetch = 0 : i64, scratch_operands = 0 : i64, tpu.core_type = #tpu.core_type<tc>, window_params = [{transform_indices = @transform_0, window_bounds = array<i64: 256, 96>}, {pipeline_mode = #tpu.pipeline_mode<synchronous>, transform_indices = @transform_1, window_bounds = array<i64: 1024, 384>}, {pipeline_mode = #tpu.pipeline_mode<synchronous>, transform_indices = @transform_2, window_bounds = array<i64: 1, 1152>}, {transform_indices = @transform_3, window_bounds = array<i64: 256, 256>}]} {
    %c0 = arith.constant 0 : index
    %c0_0 = arith.constant 0 : index
    %0 = vector.load %arg1[%c0, %c0_0] : memref<256x96xf32, #tpu.memory_space<vmem>>, vector<256x96xf32>
    %1 = arith.truncf %0 : vector<256x96xf32> to vector<256x96xbf16>
    %c0_1 = arith.constant 0 : index
    %c0_2 = arith.constant 0 : index
    %2 = vector.load %arg2[%c0_1, %c0_2] : memref<1024x384xbf16, #tpu.memory_space<vmem>>, vector<96x128xbf16>
    %c0_3 = arith.constant 0 : index
    %c0_4 = arith.constant 0 : index
    %3 = vector.load %arg3[%c0_3, %c0_4] : memref<1x1152xf32, #tpu.memory_space<vmem>>, vector<1x128xf32>
    %cst = arith.constant dense<0.000000e+00> : vector<256x128xf32>
    %4 = tpu.matmul %1, %2, %cst {dimension_numbers = #tpu.dot_dimension_numbers<[1], [0], [0], [1], [0, 0, 1, 1], [], []>} : vector<256x96xbf16>, vector<96x128xbf16>, vector<256x128xf32> -> vector<256x128xf32>
    %5 = vector.broadcast %3 : vector<1x128xf32> to vector<256x128xf32>
    %6 = arith.addf %4, %5 : vector<256x128xf32>
    %cst_5 = arith.constant 0.000000e+00 : f32
    %7 = vector.broadcast %cst_5 : f32 to vector<256x128xf32>
    %8 = arith.maximumf %6, %7 : vector<256x128xf32>
    %9 = arith.truncf %8 : vector<256x128xf32> to vector<256x128xbf16>
    %c128 = arith.constant 128 : index
    %c0_6 = arith.constant 0 : index
    %10 = vector.load %arg2[%c128, %c0_6] : memref<1024x384xbf16, #tpu.memory_space<vmem>>, vector<128x128xbf16>
    %c0_7 = arith.constant 0 : index
    %c128_8 = arith.constant 128 : index
    %11 = vector.load %arg3[%c0_7, %c128_8] : memref<1x1152xf32, #tpu.memory_space<vmem>>, vector<1x128xf32>
    %cst_9 = arith.constant dense<0.000000e+00> : vector<256x128xf32>
    %12 = tpu.matmul %9, %10, %cst_9 {dimension_numbers = #tpu.dot_dimension_numbers<[1], [0], [0], [1], [0, 0, 1, 1], [], []>} : vector<256x128xbf16>, vector<128x128xbf16>, vector<256x128xf32> -> vector<256x128xf32>
    %13 = vector.broadcast %11 : vector<1x128xf32> to vector<256x128xf32>
    %14 = arith.addf %12, %13 : vector<256x128xf32>
    %cst_10 = arith.constant 0.000000e+00 : f32
    %15 = vector.broadcast %cst_10 : f32 to vector<256x128xf32>
    %16 = arith.maximumf %14, %15 : vector<256x128xf32>
    %17 = arith.truncf %16 : vector<256x128xf32> to vector<256x128xbf16>
    %c256 = arith.constant 256 : index
    %c0_11 = arith.constant 0 : index
    %18 = vector.load %arg2[%c256, %c0_11] : memref<1024x384xbf16, #tpu.memory_space<vmem>>, vector<128x384xbf16>
    %c0_12 = arith.constant 0 : index
    %c256_13 = arith.constant 256 : index
    %19 = vector.load %arg3[%c0_12, %c256_13] : memref<1x1152xf32, #tpu.memory_space<vmem>>, vector<1x384xf32>
    %cst_14 = arith.constant dense<0.000000e+00> : vector<256x384xf32>
    %20 = tpu.matmul %17, %18, %cst_14 {dimension_numbers = #tpu.dot_dimension_numbers<[1], [0], [0], [1], [0, 0, 1, 1], [], []>} : vector<256x128xbf16>, vector<128x384xbf16>, vector<256x384xf32> -> vector<256x384xf32>
    %21 = vector.broadcast %19 : vector<1x384xf32> to vector<256x384xf32>
    %22 = arith.addf %20, %21 : vector<256x384xf32>
    %cst_15 = arith.constant 0.000000e+00 : f32
    %23 = vector.broadcast %cst_15 : f32 to vector<256x384xf32>
    %24 = arith.maximumf %22, %23 : vector<256x384xf32>
    %25 = arith.truncf %24 : vector<256x384xf32> to vector<256x384xbf16>
    %c384 = arith.constant 384 : index
    %c0_16 = arith.constant 0 : index
    %26 = vector.load %arg2[%c384, %c0_16] : memref<1024x384xbf16, #tpu.memory_space<vmem>>, vector<384x256xbf16>
    %c0_17 = arith.constant 0 : index
    %c640 = arith.constant 640 : index
    %27 = vector.load %arg3[%c0_17, %c640] : memref<1x1152xf32, #tpu.memory_space<vmem>>, vector<1x256xf32>
    %cst_18 = arith.constant dense<0.000000e+00> : vector<256x256xf32>
    %28 = tpu.matmul %25, %26, %cst_18 {dimension_numbers = #tpu.dot_dimension_numbers<[1], [0], [0], [1], [0, 0, 1, 1], [], []>} : vector<256x384xbf16>, vector<384x256xbf16>, vector<256x256xf32> -> vector<256x256xf32>
    %29 = vector.broadcast %27 : vector<1x256xf32> to vector<256x256xf32>
    %30 = arith.addf %28, %29 : vector<256x256xf32>
    %cst_19 = arith.constant 0.000000e+00 : f32
    %31 = vector.broadcast %cst_19 : f32 to vector<256x256xf32>
    %32 = arith.maximumf %30, %31 : vector<256x256xf32>
    %33 = arith.truncf %32 : vector<256x256xf32> to vector<256x256xbf16>
    %c768 = arith.constant 768 : index
    %c0_20 = arith.constant 0 : index
    %34 = vector.load %arg2[%c768, %c0_20] : memref<1024x384xbf16, #tpu.memory_space<vmem>>, vector<256x256xbf16>
    %c0_21 = arith.constant 0 : index
    %c896 = arith.constant 896 : index
    %35 = vector.load %arg3[%c0_21, %c896] : memref<1x1152xf32, #tpu.memory_space<vmem>>, vector<1x256xf32>
    %cst_22 = arith.constant dense<0.000000e+00> : vector<256x256xf32>
    %36 = tpu.matmul %33, %34, %cst_22 {dimension_numbers = #tpu.dot_dimension_numbers<[1], [0], [0], [1], [0, 0, 1, 1], [], []>} : vector<256x256xbf16>, vector<256x256xbf16>, vector<256x256xf32> -> vector<256x256xf32>
    %37 = vector.broadcast %35 : vector<1x256xf32> to vector<256x256xf32>
    %38 = arith.addf %36, %37 : vector<256x256xf32>
    %c0_23 = arith.constant 0 : index
    %c0_24 = arith.constant 0 : index
    %39 = vector.load %arg4[%c0_23, %c0_24] : memref<256x256xf32, #tpu.memory_space<vmem>>, vector<256x256xf32>
    tpu.vector_store %arg4[%c0_23, %c0_24], %38 {strides = array<i32>} : memref<256x256xf32, #tpu.memory_space<vmem>>, vector<256x256xf32>,
    return
  }
  func.func @transform_0(%arg0: i32) -> (i32, i32) {
    %c0_i32 = arith.constant 0 : i32
    %c0_i32_0 = arith.constant 0 : i32
    return %arg0, %c0_i32 : i32, i32
  }
  func.func @transform_1(%arg0: i32) -> (i32, i32) {
    %c0_i32 = arith.constant 0 : i32
    %c0_i32_0 = arith.constant 0 : i32
    %c0_i32_1 = arith.constant 0 : i32
    return %c0_i32, %c0_i32_0 : i32, i32
  }
  func.func @transform_2(%arg0: i32) -> (i32, i32) {
    %c0_i32 = arith.constant 0 : i32
    %c0_i32_0 = arith.constant 0 : i32
    %c0_i32_1 = arith.constant 0 : i32
    return %c0_i32, %c0_i32_0 : i32, i32
  }
  func.func @transform_3(%arg0: i32) -> (i32, i32) {
    %c0_i32 = arith.constant 0 : i32
    %c0_i32_0 = arith.constant 0 : i32
    return %arg0, %c0_i32 : i32, i32
  }
}

</mosaic_0001>

<bundles_post_ra>
// kernel: _mlpb_forward_jit.1
= control target key start
LH: loop header
LB: loop body
LE: loop exit
PB: predicated region body
PF: predicated region fallthrough
CT: control target
= control target key end

     0   :  { %8 = vsyncpa [#allocation3], 0  ;;  %s3277_s12 = smov [#allocation2]   ;;  %s4056_s0 = inlined_call_operand.vmem [shape: f32[256,96], index: 0, kind: input, shape index: {}]   ;;  %s4057_s1 = inlined_call_operand.hbm [shape: bf16[1024,384], index: 1, kind: input, shape index: {}]   ;;  %s4058_s2 = inlined_call_operand.vmem [shape: f32[1,1152], index: 2, kind: input, shape index: {}]   ;;  %s4059_s3 = inlined_call_operand.vmem [shape: f32[256,256], index: 3, kind: output, shape index: {}]  }
   0x1   :  { %s16_s13 = sshll.u32 %s3277_s12, 4  ;;  %s3253_s16 = scalar_lea.hbm %s4057_s1, 24576  ;;  %s17_s13 = int_to_ptr.vmem [resolvable:$true] %s16_s13 }
   0x2   :  { %p3254_p0 = scmp.ne.s32.totalorder %s4057_s1, %s3253_s16  ;;  %p3257_p1 = scmp.lt.u32.totalorder %s3253_s16, %s4057_s1 }
   0x4   :  { %p3259_p2 = pnand %p3257_p1, %p3254_p0 }
   0x6   :  { %3262 = shalt.err (!%p3259_p2)
}
   0x7   :  { %s3263_s21 = scalar_lea.vmem %s17_s13, 24576  ;;  %p3268_p4 = scmp.lt.s32.totalorder %s17_s13, %s17_s13 }
   0x8   :  { %p3264_p3 = scmp.ne.s32.totalorder %s17_s13, %s3263_s21  ;;  %p3269_p5 = scmp.lt.s32.totalorder %s3263_s21, %s3263_s21 }
   0xa   :  { %p3270_p6 = por %p3269_p5, %p3268_p4 }
   0xc   :  { %p3271_p7 = pnand %p3270_p6, %p3264_p3 }
   0xe   :  { %3274 = shalt.err (!%p3271_p7)
}
   0xf   :  { %s3278_s22 = smov 192   ;;  %s3279_s23 = smov 12  }
  0x10   :  { %22 = dma.hbm_to_vmem [thread:$0]  %s4057_s1, 24576, %s17_s13, [#allocation3], %s3278_s22, %s3278_s22, %s3279_s23  }
  0x11   :  { %3275 = dma.done.wait [#allocation3], 24576  }
  0x12   :  { %3276 = vsyncadd [#allocation3], 4294942720  ;;  %v3087_v0 = vld [vmem:[#allocation2] ss:$12 sps:$4 sm:$0xff]   ;;  %v3088_v1 = vld [vmem:[#allocation2 + $0x18] ss:$12 sps:$4 sm:$0xff]  }
  0x13   :  { %2799 = vmatprep.subr.bf16.mxu0 %v3087_v0  ;;  %v3089_v2 = vld [vmem:[#allocation2 + $0x30] ss:$12 sps:$4 sm:$0xff]   ;;  %v29_v3 = vld [vmem:[%s4056_s0] sm:$0xff]  ;;  %v30_v4 = vld [vmem:[%s4056_s0 + $0x8] sm:$0xff]  ;;  %vm132_vm0 = vcmask 785408  }
  0x14   :  { %2800 = vmatpush3.bf16.msra.mxu0 %v3087_v0  ;;  %v61_v5 = vpack.c.bf16 %v30_v4, %v29_v3  ;;  %v3090_v6 = vld [vmem:[#allocation2 + $0x48] ss:$12 sps:$4 sm:$0xff]   ;;  %v3091_v7 = vld [vmem:[#allocation2 + $0x60] ss:$12 sps:$4 sm:$0xff]   ;;  %v3092_v8 = vld [vmem:[#allocation2 + $0x78] ss:$12 sps:$4 sm:$0xff]  }
  0x15   :  { %2801 = vmatprep.subr.bf16.mxu0 %v3088_v1  ;;  %v31_v9 = vld [vmem:[%s4056_s0 + $0x10] sm:$0xff]  ;;  %v32_v10 = vld [vmem:[%s4056_s0 + $0x18] sm:$0xff]  ;;  %v3093_v11 = vld [vmem:[#allocation2 + $0xc0] ss:$12 sps:$4 sm:$0xff]  }
  0x16   :  { %2811 = vmatprep.mubr.msk.bf16.mxu0 %vm132_vm0, %v61_v5  ;;  %v33_v12 = vld [vmem:[%s4056_s0 + $0x20] sm:$0xff]  ;;  %2939 = vmatprep.subr.bf16.mxu1 %v3093_v11  ;;  %v34_v14 = vld [vmem:[%s4056_s0 + $0x28] sm:$0xff]  ;;  %v62_v15 = vpack.c.bf16 %v32_v10, %v31_v9  ;;  %v3095_v17 = vld [vmem:[#allocation2 + $0xf0] ss:$12 sps:$4 sm:$0xff]  }
  0x17   :  { %v3094_v13 = vld [vmem:[#allocation2 + $0xd8] ss:$12 sps:$4 sm:$0xff]   ;;  %2947 = vmatpush3.bf16.msra.mxu1 %v3093_v11  ;;  %v63_v16 = vpack.c.bf16 %v34_v14, %v33_v12  ;;  %v35_v18 = vld [vmem:[%s4056_s0 + $0x30] sm:$0xff]  ;;  %v38_v22 = vld [vmem:[%s4056_s0 + $0x48] sm:$0xff] }
  0x18   :  { %2802 = vmatpush3.bf16.msra.mxu0 %v3088_v1  ;;  %2940 = vmatprep.subr.bf16.mxu1 %v3094_v13  ;;  %v36_v19 = vld [vmem:[%s4056_s0 + $0x38] sm:$0xff]  ;;  %v3096_v20 = vld [vmem:[#allocation2 + $0x108] ss:$12 sps:$4 sm:$0xff]   ;;  %v37_v21 = vld [vmem:[%s4056_s0 + $0x40] sm:$0xff] }
  0x19   :  { %2803 = vmatprep.subr.bf16.mxu0 %v3089_v2  ;;  %v3097_v23 = vld [vmem:[#allocation2 + $0x120] ss:$12 sps:$4 sm:$0xff]   ;;  %v64_v24 = vpack.c.bf16 %v36_v19, %v35_v18  ;;  %v65_v25 = vpack.c.bf16 %v38_v22, %v37_v21  ;;  %v39_v26 = vld [vmem:[%s4056_s0 + $0x50] sm:$0xff]  ;;  %v40_v27 = vld [vmem:[%s4056_s0 + $0x58] sm:$0xff] }
  0x1a   :  { %v3098_v28 = vld [vmem:[#allocation2 + $0x138] ss:$12 sps:$4 sm:$0xff]   ;;  %v42_v30 = vld [vmem:[%s4056_s0 + $0x68] sm:$0xff]  ;;  %v3099_v31 = vld [vmem:[#allocation2 + $0x150] ss:$12 sps:$4 sm:$0xff]   ;;  %v66_v32 = vpack.c.bf16 %v40_v27, %v39_v26 }
  0x1b   :  { %2948 = vmatpush3.bf16.msra.mxu1 %v3094_v13  ;;  %v41_v29 = vld [vmem:[%s4056_s0 + $0x60] sm:$0xff]  ;;  %v43_v34 = vld [vmem:[%s4056_s0 + $0x70] sm:$0xff]  ;;  %v44_v35 = vld [vmem:[%s4056_s0 + $0x78] sm:$0xff] }
  0x1c   :  { %2804 = vmatpush3.bf16.msra.mxu0 %v3089_v2  ;;  %2941 = vmatprep.subr.bf16.mxu1 %v3095_v17  ;;  %v67_v33 = vpack.c.bf16 %v42_v30, %v41_v29  ;;  %v45_v36 = vld [vmem:[%s4056_s0 + $0x80] sm:$0xff]  ;;  %v46_v37 = vld [vmem:[%s4056_s0 + $0x88] sm:$0xff]  ;;  %v68_v38 = vpack.c.bf16 %v44_v35, %v43_v34  ;;  %v47_v40 = vld [vmem:[%s4056_s0 + $0x90] sm:$0xff] }
  0x1d   :  { %2805 = vmatprep.subr.bf16.mxu0 %v3090_v6  ;;  %v69_v39 = vpack.c.bf16 %v46_v37, %v45_v36  ;;  %v48_v41 = vld [vmem:[%s4056_s0 + $0x98] sm:$0xff]  ;;  %v49_v42 = vld [vmem:[%s4056_s0 + $0xa0] sm:$0xff]  ;;  %v50_v43 = vld [vmem:[%s4056_s0 + $0xa8] sm:$0xff] }
  0x1e   :  { %v70_v44 = vpack.c.bf16 %v48_v41, %v47_v40  ;;  %v71_v45 = vpack.c.bf16 %v50_v43, %v49_v42  ;;  %v51_v46 = vld [vmem:[%s4056_s0 + $0xb0] sm:$0xff]  ;;  %v52_v47 = vld [vmem:[%s4056_s0 + $0xb8] sm:$0xff]  ;;  %v53_v48 = vld [vmem:[%s4056_s0 + $0xc0] sm:$0xff] }
  0x1f   :  { %2949 = vmatpush3.bf16.msra.mxu1 %v3095_v17  ;;  %v54_v49 = vld [vmem:[%s4056_s0 + $0xc8] sm:$0xff]  ;;  %v72_v50 = vpack.c.bf16 %v52_v47, %v51_v46  ;;  %v55_v52 = vld [vmem:[%s4056_s0 + $0xd0] sm:$0xff]  ;;  %v56_v53 = vld [vmem:[%s4056_s0 + $0xd8] sm:$0xff] }
  0x20   :  { %2806 = vmatpush3.bf16.msra.mxu0 %v3090_v6  ;;  %2942 = vmatprep.subr.bf16.mxu1 %v3096_v20  ;;  %v73_v51 = vpack.c.bf16 %v54_v49, %v53_v48  ;;  %v57_v54 = vld [vmem:[%s4056_s0 + $0xe0] sm:$0xff]  ;;  %v58_v55 = vld [vmem:[%s4056_s0 + $0xe8] sm:$0xff]  ;;  %v74_v56 = vpack.c.bf16 %v56_v53, %v55_v52  ;;  %v59_v58 = vld [vmem:[%s4056_s0 + $0xf0] sm:$0xff] }
  0x21   :  { %2807 = vmatprep.subr.bf16.mxu0 %v3091_v7  ;;  %v75_v57 = vpack.c.bf16 %v58_v55, %v57_v54  ;;  %v60_v59 = vld [vmem:[%s4056_s0 + $0xf8] sm:$0xff]  ;;  %v3100_v61 = vld [vmem:[#allocation2 + $0x168] ss:$12 sps:$4 sm:$0xff]   ;;  %v3103_v62 = vld [vmem:[#allocation2 + $0x184] ss:$12 sps:$4 sm:$0xff]  }
  0x22   :  { %v76_v60 = vpack.c.bf16 %v60_v59, %v59_v58  ;;  %v3425_v63 = vld [vmem:[#allocation2 + $0x188] ss:$12 sps:$4 sm:$0xff]   ;;  %v3431_v0 = vld [vmem:[%s4058_s2] ss:$0 sm:$0xff]  ;;  %v3105_v27 = vld [vmem:[#allocation2 + $0x198] ss:$12 sps:$4 sm:$0xff]  }
  0x23   :  { %2950 = vmatpush3.bf16.msra.mxu1 %v3096_v20  ;;  %v3107_v19 = vld [vmem:[#allocation2 + $0x19c] ss:$12 sps:$4 sm:$0xff]   ;;  %v3111_v29 = vld [vmem:[#allocation2 + $0x1b4] ss:$12 sps:$4 sm:$0xff]   ;;  %v3115_v37 = vld [vmem:[#allocation2 + $0x1cc] ss:$12 sps:$4 sm:$0xff]  }
  0x24   :  { %2808 = vmatpush3.bf16.msra.mxu0 %v3091_v7  ;;  %2943 = vmatprep.subr.bf16.mxu1 %v3097_v23  ;;  %v3109_v34 = vld [vmem:[#allocation2 + $0x1b0] ss:$12 sps:$4 sm:$0xff]   ;;  %v3117_v52 = vld [vmem:[#allocation2 + $0x1e0] ss:$12 sps:$4 sm:$0xff]  }
  0x25   :  { %2809 = vmatprep.subr.bf16.mxu0 %v3092_v8  ;;  %v3119_v47 = vld [vmem:[#allocation2 + $0x1e4] ss:$12 sps:$4 sm:$0xff]   ;;  %v3123_v55 = vld [vmem:[#allocation2 + $0x1fc] ss:$12 sps:$4 sm:$0xff]  }
  0x27   :  { %2951 = vmatpush3.bf16.msra.mxu1 %v3097_v23 }
  0x28   :  { %2810 = vmatpush3.bf16.msra.mxu0 %v3092_v8  ;;  %2944 = vmatprep.subr.bf16.mxu1 %v3098_v28 }
  0x29   :  { %2843 = vmatprep.subr.bf16.mxu0 %v3093_v11 }
  0x2b   :  { %2812 = vmatmul.mubr.msk.bf16.vlgmr.msra.gmra.mrb[0].mxu0 %vm132_vm0, %v62_v15  ;;  %2952 = vmatpush3.bf16.msra.mxu1 %v3098_v28 }
  0x2c   :  { %2815 = vmatprep.mubr.msk.bf16.mxu0 %vm132_vm0, %v63_v16  ;;  %2844 = vmatpush3.bf16.msra.mxu0 %v3093_v11  ;;  %v3101_v16 = vld [vmem:[#allocation2 + $0x180] ss:$12 sps:$4 sm:$0xff]  }
  0x2d   :  { %2845 = vmatprep.subr.bf16.mxu0 %v3094_v13  ;;  %2945 = vmatprep.subr.bf16.mxu1 %v3099_v31 }
  0x2f   :  { %2953 = vmatpush3.bf16.msra.mxu1 %v3099_v31 }
  0x30   :  { %2846 = vmatpush3.bf16.msra.mxu0 %v3094_v13  ;;  %2946 = vmatprep.subr.bf16.mxu1 %v3100_v61 }
  0x31   :  { %2847 = vmatprep.subr.bf16.mxu0 %v3095_v17 }
  0x33   :  { %2816 = vmatmul.mubr.msk.bf16.gmra.mrb[4].mxu0 %vm132_vm0, %v64_v24  ;;  %2954 = vmatpush3.bf16.msra.mxu1 %v3100_v61 }
  0x34   :  { %2819 = vmatprep.mubr.msk.bf16.mxu0 %vm132_vm0, %v65_v25  ;;  %2848 = vmatpush3.bf16.msra.mxu0 %v3095_v17 }
  0x35   :  { %2849 = vmatprep.subr.bf16.mxu0 %v3096_v20  ;;  %2891 = vmatprep.subr.bf16.mxu1 %v3425_v63 }
  0x38   :  { %2850 = vmatpush3.bf16.msra.mxu0 %v3096_v20 }
  0x39   :  { %2851 = vmatprep.subr.bf16.mxu0 %v3097_v23 }
  0x3b   :  { %2820 = vmatmul.mubr.msk.bf16.gmra.mrb[8].mxu0 %vm132_vm0, %v66_v32 }
  0x3c   :  { %2823 = vmatprep.mubr.msk.bf16.mxu0 %vm132_vm0, %v67_v33  ;;  %2852 = vmatpush3.bf16.msra.mxu0 %v3097_v23 }
  0x3d   :  { %2853 = vmatprep.subr.bf16.mxu0 %v3098_v28 }
  0x40   :  { %2854 = vmatpush3.bf16.msra.mxu0 %v3098_v28 }
  0x41   :  { %2855 = vmatprep.subr.bf16.mxu0 %v3099_v31 }
  0x43   :  { %2824 = vmatmul.mubr.msk.bf16.gmra.mrb[12].mxu0 %vm132_vm0, %v68_v38 }
  0x44   :  { %2827 = vmatprep.mubr.msk.bf16.mxu0 %vm132_vm0, %v69_v39  ;;  %2856 = vmatpush3.bf16.msra.mxu0 %v3099_v31 }
  0x45   :  { %2857 = vmatprep.subr.bf16.mxu0 %v3100_v61 }
  0x48   :  { %2858 = vmatpush3.bf16.msra.mxu0 %v3100_v61 }
  0x49   :  { %847 = vmatprep.subr.bf16.mxu0 %v3103_v62 }
  0x4b   :  { %2828 = vmatmul.mubr.msk.bf16.gmra.mrb[16].mxu0 %vm132_vm0, %v70_v44 }
  0x4c   :  { %2831 = vmatprep.mubr.msk.bf16.mxu0 %vm132_vm0, %v71_v45  ;;  %v3113_v45 = vld [vmem:[#allocation2 + $0x1c8] ss:$12 sps:$4 sm:$0xff]  }
  0x53   :  { %2832 = vmatmul.mubr.msk.bf16.gmra.mrb[20].mxu0 %vm132_vm0, %v72_v50 }
  0x54   :  { %2835 = vmatprep.mubr.msk.bf16.mxu0 %vm132_vm0, %v73_v51 }
  0x5b   :  { %2836 = vmatmul.mubr.msk.bf16.gmra.mrb[24].mxu0 %vm132_vm0, %v74_v56 }
  0x5c   :  { %2839 = vmatprep.mubr.msk.bf16.mxu0 %vm132_vm0, %v75_v57 }
  0x63   :  { %2840 = vmatmul.mubr.msk.bf16.gmra.mrb[28].mxu0 %vm132_vm0, %v76_v60 }
  0xfe   :  { %v2813_v1 = vpop.f32.mrb[0].mxu0 }
  0xff   :  { %v224_v2 = vadd.f32 %v2813_v1, %v3431_v0  ;;  %v215_v3 = vpop.f32.mrb[1].mxu0  ;;  %v3121_v1 = vld [vmem:[#allocation2 + $0x1f8] ss:$12 sps:$4 sm:$0xff]  }
 0x100   :  { %v216_v4 = vadd.f32 %v3431_v0, %v215_v3  ;;  %v2814_v5 = vpop.f32.mrb[2].mxu0 }
 0x101   :  { %v227_v6 = vadd.f32 %v2814_v5, %v3431_v0  ;;  %v218_v7 = vpop.f32.mrb[3].mxu0  ;;  %v344_v9 = vmax.f32 %v224_v2, 0.0 }
 0x102   :  { %v219_v8 = vadd.f32 %v3431_v0, %v218_v7  ;;  %v342_v11 = vmax.f32 %v216_v4, 0.0 }
 0x103   :  { %v345_v10 = vmax.f32 %v227_v6, 0.0 }
 0x104   :  { %v343_v12 = vmax.f32 %v219_v8, 0.0 }
 0x105   :  { %v375_v13 = vpack.c.bf16 %v345_v10, %v344_v9 }
 0x106   :  { %v374_v14 = vpack.c.bf16 %v343_v12, %v342_v11  ;;  %v2817_v15 = vpop.f32.mrb[4].mxu0 }
 0x107   :  { %v240_v17 = vadd.f32 %v2817_v15, %v3431_v0  ;;  %v231_v18 = vpop.f32.mrb[5].mxu0 }
 0x108   :  { %v232_v20 = vadd.f32 %v3431_v0, %v231_v18  ;;  %v2818_v21 = vpop.f32.mrb[6].mxu0  ;;  %2859 = vmatprep.mubr.bf16.mxu0 %v374_v14 }
 0x109   :  { %v348_v22 = vmax.f32 %v240_v17, 0.0  ;;  %v243_v23 = vadd.f32 %v2818_v21, %v3431_v0  ;;  %v234_v24 = vpop.f32.mrb[7].mxu0  ;;  %2860 = vmatmul.mubr.bf16.vlgmr.msra.gmra.mrb[32].mxu0 %v375_v13 }
 0x10a   :  { %v346_v25 = vmax.f32 %v232_v20, 0.0  ;;  %v235_v26 = vadd.f32 %v3431_v0, %v234_v24  ;;  %848 = vmatpush1.bf16.msra.mxu0 %v3101_v16 }
 0x10b   :  { %v349_v28 = vmax.f32 %v243_v23, 0.0  ;;  %849 = vmatprep.subr.bf16.mxu0 %v3107_v19  ;;  %v3108_v23 = vld [vmem:[#allocation2 + $0x1a0] ss:$12 sps:$4 sm:$0xff]  }
 0x10c   :  { %v347_v30 = vmax.f32 %v235_v26, 0.0 }
 0x10d   :  { %v377_v31 = vpack.c.bf16 %v349_v28, %v348_v22 }
 0x10e   :  { %v376_v32 = vpack.c.bf16 %v347_v30, %v346_v25  ;;  %v2821_v33 = vpop.f32.mrb[8].mxu0  ;;  %850 = vmatpush1.bf16.msra.mxu0 %v3105_v27 }
 0x10f   :  { %v256_v35 = vadd.f32 %v2821_v33, %v3431_v0  ;;  %v247_v36 = vpop.f32.mrb[9].mxu0  ;;  %851 = vmatprep.subr.bf16.mxu0 %v3111_v29 }
 0x110   :  { %2863 = vmatprep.mubr.bf16.mxu0 %v376_v32  ;;  %v248_v38 = vadd.f32 %v3431_v0, %v247_v36  ;;  %v2822_v39 = vpop.f32.mrb[10].mxu0  ;;  %v3112_v32 = vld [vmem:[#allocation2 + $0x1b8] ss:$12 sps:$4 sm:$0xff]  }
 0x111   :  { %2864 = vmatmul.mubr.bf16.gmra.mrb[36].mxu0 %v377_v31  ;;  %v352_v40 = vmax.f32 %v256_v35, 0.0  ;;  %v259_v41 = vadd.f32 %v2822_v39, %v3431_v0  ;;  %v250_v42 = vpop.f32.mrb[11].mxu0  ;;  %v3116_v39 = vld [vmem:[#allocation2 + $0x1d0] ss:$12 sps:$4 sm:$0xff]  }
 0x112   :  { %v350_v43 = vmax.f32 %v248_v38, 0.0  ;;  %v251_v44 = vadd.f32 %v3431_v0, %v250_v42  ;;  %852 = vmatpush1.bf16.msra.mxu0 %v3109_v34 }
 0x113   :  { %v353_v46 = vmax.f32 %v259_v41, 0.0  ;;  %853 = vmatprep.subr.bf16.mxu0 %v3115_v37 }
 0x114   :  { %v351_v48 = vmax.f32 %v251_v44, 0.0 }
 0x115   :  { %v379_v49 = vpack.c.bf16 %v353_v46, %v352_v40 }
 0x116   :  { %v378_v50 = vpack.c.bf16 %v351_v48, %v350_v43  ;;  %v2825_v51 = vpop.f32.mrb[12].mxu0  ;;  %854 = vmatpush1.bf16.msra.mxu0 %v3113_v45 }
 0x117   :  { %v272_v53 = vadd.f32 %v2825_v51, %v3431_v0  ;;  %v263_v54 = vpop.f32.mrb[13].mxu0  ;;  %855 = vmatprep.subr.bf16.mxu0 %v3119_v47  ;;  %v3120_v47 = vld [vmem:[#allocation2 + $0x1e8] ss:$12 sps:$4 sm:$0xff]  }
 0x118   :  { %2867 = vmatprep.mubr.bf16.mxu0 %v378_v50  ;;  %v264_v56 = vadd.f32 %v3431_v0, %v263_v54  ;;  %v2826_v57 = vpop.f32.mrb[14].mxu0  ;;  %v3124_v54 = vld [vmem:[#allocation2 + $0x200] ss:$12 sps:$4 sm:$0xff]  }
 0x119   :  { %2868 = vmatmul.mubr.bf16.gmra.mrb[40].mxu0 %v379_v49  ;;  %v356_v58 = vmax.f32 %v272_v53, 0.0  ;;  %v275_v59 = vadd.f32 %v2826_v57, %v3431_v0  ;;  %v266_v60 = vpop.f32.mrb[15].mxu0 }
 0x11a   :  { %v354_v61 = vmax.f32 %v264_v56, 0.0  ;;  %v267_v62 = vadd.f32 %v3431_v0, %v266_v60  ;;  %856 = vmatpush1.bf16.msra.mxu0 %v3117_v52 }
 0x11b   :  { %v357_v2 = vmax.f32 %v275_v59, 0.0  ;;  %857 = vmatprep.subr.bf16.mxu0 %v3123_v55 }
 0x11c   :  { %v355_v3 = vmax.f32 %v267_v62, 0.0 }
 0x11d   :  { %v381_v4 = vpack.c.bf16 %v357_v2, %v356_v58 }
 0x11e   :  { %v380_v5 = vpack.c.bf16 %v355_v3, %v354_v61  ;;  %v2829_v6 = vpop.f32.mrb[16].mxu0  ;;  %858 = vmatpush1.bf16.msra.mxu0 %v3121_v1 }
 0x11f   :  { %v288_v7 = vadd.f32 %v2829_v6, %v3431_v0  ;;  %v279_v8 = vpop.f32.mrb[17].mxu0  ;;  %v3128_v6 = vld [vmem:[#allocation2 + $0x218] ss:$12 sps:$4 sm:$0xff]  }
 0x120   :  { %2871 = vmatprep.mubr.bf16.mxu0 %v380_v5  ;;  %v280_v9 = vadd.f32 %v3431_v0, %v279_v8  ;;  %v2830_v10 = vpop.f32.mrb[18].mxu0  ;;  %v3125_v5 = vld [vmem:[#allocation2 + $0x210] ss:$12 sps:$4 sm:$0xff]   ;;  %v3129_v8 = vld [vmem:[#allocation2 + $0x228] ss:$12 sps:$4 sm:$0xff]  }
 0x121   :  { %2872 = vmatmul.mubr.bf16.gmra.mrb[44].mxu0 %v381_v4  ;;  %v360_v11 = vmax.f32 %v288_v7, 0.0  ;;  %v291_v12 = vadd.f32 %v2830_v10, %v3431_v0  ;;  %v282_v13 = vpop.f32.mrb[19].mxu0  ;;  %v3127_v4 = vld [vmem:[#allocation2 + $0x214] ss:$12 sps:$4 sm:$0xff]   ;;  %v3131_v7 = vld [vmem:[#allocation2 + $0x22c] ss:$12 sps:$4 sm:$0xff]  }
 0x122   :  { %v358_v14 = vmax.f32 %v280_v9, 0.0  ;;  %v283_v15 = vadd.f32 %v3431_v0, %v282_v13  ;;  %859 = vmatprep.subr.bf16.mxu0 %v3127_v4  ;;  %v3132_v9 = vld [vmem:[#allocation2 + $0x230] ss:$12 sps:$4 sm:$0xff]   ;;  %v3470_v10 = vld [vmem:[%s4058_s2 + $0x1] ss:$0 sm:$0xff] }
 0x123   :  { %v361_v16 = vmax.f32 %v291_v12, 0.0  ;;  %860 = vmatpush1.bf16.msra.mxu0 %v3125_v5 }
 0x124   :  { %v359_v17 = vmax.f32 %v283_v15, 0.0  ;;  %861 = vmatprep.subr.bf16.mxu0 %v3131_v7 }
 0x125   :  { %v383_v18 = vpack.c.bf16 %v361_v16, %v360_v11  ;;  %v3135_v16 = vld [vmem:[#allocation2 + $0x244] ss:$12 sps:$4 sm:$0xff]  }
 0x126   :  { %v382_v19 = vpack.c.bf16 %v359_v17, %v358_v14  ;;  %v2833_v20 = vpop.f32.mrb[20].mxu0 }
 0x127   :  { %v304_v21 = vadd.f32 %v2833_v20, %v3431_v0  ;;  %v295_v22 = vpop.f32.mrb[21].mxu0  ;;  %862 = vmatpush1.bf16.msra.mxu0 %v3129_v8 }
 0x128   :  { %2875 = vmatprep.mubr.bf16.mxu1 %v382_v19  ;;  %v296_v24 = vadd.f32 %v3431_v0, %v295_v22  ;;  %v2834_v25 = vpop.f32.mrb[22].mxu0 }
 0x129   :  { %2876 = vmatmul.mubr.bf16.vlgmr.msra.gmra.mrb[0].mxu1 %v383_v18  ;;  %v364_v26 = vmax.f32 %v304_v21, 0.0  ;;  %v307_v27 = vadd.f32 %v2834_v25, %v3431_v0  ;;  %v298_v28 = vpop.f32.mrb[23].mxu0 }
 0x12a   :  { %v362_v29 = vmax.f32 %v296_v24, 0.0  ;;  %v299_v30 = vadd.f32 %v3431_v0, %v298_v28  ;;  %2892 = vmatpush3.bf16.msra.mxu1 %v3425_v63 }
 0x12b   :  { %v365_v31 = vmax.f32 %v307_v27, 0.0  ;;  %2893 = vmatprep.subr.bf16.mxu1 %v3108_v23  ;;  %v3133_v27 = vld [vmem:[#allocation2 + $0x240] ss:$12 sps:$4 sm:$0xff]  }
 0x12c   :  { %v363_v33 = vmax.f32 %v299_v30, 0.0  ;;  %v3138_v30 = vld [vmem:[#allocation2 + $0x25c] ss:$12 sps:$4 sm:$0xff]  }
 0x12d   :  { %v385_v34 = vpack.c.bf16 %v365_v31, %v364_v26 }
 0x12e   :  { %v384_v35 = vpack.c.bf16 %v363_v33, %v362_v29  ;;  %v2837_v36 = vpop.f32.mrb[24].mxu0  ;;  %2894 = vmatpush3.bf16.msra.mxu1 %v3108_v23 }
 0x12f   :  { %v320_v37 = vadd.f32 %v2837_v36, %v3431_v0  ;;  %v311_v38 = vpop.f32.mrb[25].mxu0  ;;  %2895 = vmatprep.subr.bf16.mxu1 %v3112_v32 }
 0x130   :  { %2879 = vmatprep.mubr.bf16.mxu1 %v384_v35  ;;  %v312_v40 = vadd.f32 %v3431_v0, %v311_v38  ;;  %v2838_v41 = vpop.f32.mrb[26].mxu0  ;;  %v3136_v38 = vld [vmem:[#allocation2 + $0x258] ss:$12 sps:$4 sm:$0xff]  }
 0x131   :  { %2880 = vmatmul.mubr.bf16.gmra.mrb[4].mxu1 %v385_v34  ;;  %v368_v42 = vmax.f32 %v320_v37, 0.0  ;;  %v323_v63 = vadd.f32 %v2838_v41, %v3431_v0  ;;  %v314_v43 = vpop.f32.mrb[27].mxu0 }
 0x132   :  { %v366_v44 = vmax.f32 %v312_v40, 0.0  ;;  %v315_v45 = vadd.f32 %v3431_v0, %v314_v43  ;;  %2896 = vmatpush3.bf16.msra.mxu1 %v3112_v32  ;;  %v3141_v40 = vld [vmem:[#allocation2 + $0x274] ss:$12 sps:$4 sm:$0xff]  }
 0x133   :  { %v369_v46 = vmax.f32 %v323_v63, 0.0  ;;  %2897 = vmatprep.subr.bf16.mxu1 %v3116_v39 }
 0x134   :  { %v367_v48 = vmax.f32 %v315_v45, 0.0 }
 0x135   :  { %v387_v49 = vpack.c.bf16 %v369_v46, %v368_v42 }
 0x136   :  { %v386_v50 = vpack.c.bf16 %v367_v48, %v366_v44  ;;  %v2841_v51 = vpop.f32.mrb[28].mxu0  ;;  %2898 = vmatpush3.bf16.msra.mxu1 %v3116_v39  ;;  %v3139_v44 = vld [vmem:[#allocation2 + $0x270] ss:$12 sps:$4 sm:$0xff]  }
 0x137   :  { %v336_v52 = vadd.f32 %v2841_v51, %v3431_v0  ;;  %v327_v53 = vpop.f32.mrb[29].mxu0  ;;  %2899 = vmatprep.subr.bf16.mxu1 %v3120_v47 }
 0x138   :  { %2883 = vmatprep.mubr.bf16.mxu1 %v386_v50  ;;  %v328_v55 = vadd.f32 %v3431_v0, %v327_v53  ;;  %v2842_v56 = vpop.f32.mrb[30].mxu0 }
 0x139   :  { %2884 = vmatmul.mubr.bf16.gmra.mrb[8].mxu1 %v387_v49  ;;  %v372_v57 = vmax.f32 %v336_v52, 0.0  ;;  %v339_v58 = vadd.f32 %v2842_v56, %v3431_v0  ;;  %v330_v59 = vpop.f32.mrb[31].mxu0 }
 0x13a   :  { %v370_v60 = vmax.f32 %v328_v55, 0.0  ;;  %v331_v61 = vadd.f32 %v3431_v0, %v330_v59  ;;  %2900 = vmatpush3.bf16.msra.mxu1 %v3120_v47  ;;  %v3280_v0 = vmov 0   ;;  %v3144_v47 = vld [vmem:[#allocation2 + $0x28c] ss:$12 sps:$4 sm:$0xff]   ;;  %v3142_v55 = vld [vmem:[#allocation2 + $0x288] ss:$12 sps:$4 sm:$0xff]  }
 0x13b   :  { %v373_v62 = vmax.f32 %v339_v58, 0.0  ;;  %2901 = vmatprep.subr.bf16.mxu1 %v3124_v54  ;;  %879 = vmatprep.mubr.bf16.mxu0 %v3280_v0 }
 0x13c   :  { %v371_v1 = vmax.f32 %v331_v61, 0.0 }
 0x13d   :  { %v389_v2 = vpack.c.bf16 %v373_v62, %v372_v57  ;;  %v3147_v57 = vld [vmem:[#allocation2 + $0x2a4] ss:$12 sps:$4 sm:$0xff]   ;;  %v3145_v62 = vld [vmem:[#allocation2 + $0x2a0] ss:$12 sps:$4 sm:$0xff]  }
 0x13e   :  { %v388_v3 = vpack.c.bf16 %v371_v1, %v370_v60  ;;  %2902 = vmatpush3.bf16.msra.mxu1 %v3124_v54 }
 0x13f   :  { %2903 = vmatprep.subr.bf16.mxu1 %v3128_v6 }
 0x140   :  { %2887 = vmatprep.mubr.bf16.mxu1 %v388_v3  ;;  %v3150_v3 = vld [vmem:[#allocation2 + $0x2bc] ss:$12 sps:$4 sm:$0xff]  }
 0x141   :  { %2888 = vmatmul.mubr.bf16.gmra.mrb[12].mxu1 %v389_v2 }
 0x142   :  { %2904 = vmatpush3.bf16.msra.mxu1 %v3128_v6 }
 0x143   :  { %2905 = vmatprep.subr.bf16.mxu1 %v3132_v9 }
 0x146   :  { %2906 = vmatpush3.bf16.msra.mxu1 %v3132_v9 }
 0x147   :  { %1645 = vmatprep.subr.bf16.mxu1 %v3135_v16 }
 0x1dc   :  { %v2861_v11 = vpop.f32.mrb[32].mxu0 }
 0x1dd   :  { %v504_v12 = vadd.f32 %v2861_v11, %v3470_v10  ;;  %v495_v13 = vpop.f32.mrb[33].mxu0 }
 0x1de   :  { %v496_v14 = vadd.f32 %v3470_v10, %v495_v13  ;;  %v2862_v15 = vpop.f32.mrb[34].mxu0 }
 0x1df   :  { %v507_v17 = vadd.f32 %v2862_v15, %v3470_v10  ;;  %v498_v18 = vpop.f32.mrb[35].mxu0  ;;  %v624_v20 = vmax.f32 %v504_v12, 0.0  ;;  %v3148_v12 = vld [vmem:[#allocation2 + $0x2b8] ss:$12 sps:$4 sm:$0xff]  }
 0x1e0   :  { %v499_v19 = vadd.f32 %v3470_v10, %v498_v18  ;;  %v622_v22 = vmax.f32 %v496_v14, 0.0  ;;  %v3153_v14 = vld [vmem:[#allocation2 + $0x2d4] ss:$12 sps:$4 sm:$0xff]  }
 0x1e1   :  { %v625_v21 = vmax.f32 %v507_v17, 0.0 }
 0x1e2   :  { %v623_v23 = vmax.f32 %v499_v19, 0.0  ;;  %v3151_v19 = vld [vmem:[#allocation2 + $0x2d0] ss:$12 sps:$4 sm:$0xff]  }
 0x1e3   :  { %v655_v24 = vpack.c.bf16 %v625_v21, %v624_v20 }
 0x1e4   :  { %v654_v25 = vpack.c.bf16 %v623_v23, %v622_v22  ;;  %v2865_v26 = vpop.f32.mrb[36].mxu0  ;;  %v3156_v22 = vld [vmem:[#allocation2 + $0x2ec] ss:$12 sps:$4 sm:$0xff]  }
 0x1e5   :  { %v520_v28 = vadd.f32 %v2865_v26, %v3470_v10  ;;  %v511_v29 = vpop.f32.mrb[37].mxu0 }
 0x1e6   :  { %v512_v31 = vadd.f32 %v3470_v10, %v511_v29  ;;  %v2866_v32 = vpop.f32.mrb[38].mxu0  ;;  %880 = vmatmul.mubr.bf16.vlgmr.msra.gmra.mrb[48].mxu0 %v654_v25  ;;  %2907 = vmatprep.mubr.bf16.mxu1 %v654_v25 }
 0x1e7   :  { %v628_v33 = vmax.f32 %v520_v28, 0.0  ;;  %v523_v34 = vadd.f32 %v2866_v32, %v3470_v10  ;;  %v514_v35 = vpop.f32.mrb[39].mxu0  ;;  %2908 = vmatmul.mubr.bf16.vlgmr.msra.gmra.mrb[16].mxu1 %v655_v24  ;;  %889 = vmatprep.mubr.bf16.mxu0 %v3280_v0  ;;  %v3159_v32 = vld [vmem:[#allocation2 + $0x304] ss:$12 sps:$4 sm:$0xff]  }
 0x1e8   :  { %v626_v36 = vmax.f32 %v512_v31, 0.0  ;;  %v515_v37 = vadd.f32 %v3470_v10, %v514_v35  ;;  %1646 = vmatpush1.bf16.msra.mxu1 %v3133_v27 }
 0x1e9   :  { %v629_v39 = vmax.f32 %v523_v34, 0.0  ;;  %1647 = vmatprep.subr.bf16.mxu1 %v3138_v30  ;;  %v3154_v30 = vld [vmem:[#allocation2 + $0x2e8] ss:$12 sps:$4 sm:$0xff]  }
 0x1ea   :  { %v627_v41 = vmax.f32 %v515_v37, 0.0  ;;  %v3157_v37 = vld [vmem:[#allocation2 + $0x300] ss:$12 sps:$4 sm:$0xff]  }
 0x1eb   :  { %v657_v42 = vpack.c.bf16 %v629_v39, %v628_v33 }
 0x1ec   :  { %v656_v63 = vpack.c.bf16 %v627_v41, %v626_v36  ;;  %v2869_v43 = vpop.f32.mrb[40].mxu0  ;;  %1648 = vmatpush1.bf16.msra.mxu1 %v3136_v38 }
 0x1ed   :  { %v536_v45 = vadd.f32 %v2869_v43, %v3470_v10  ;;  %v527_v46 = vpop.f32.mrb[41].mxu0  ;;  %1649 = vmatprep.subr.bf16.mxu1 %v3141_v40  ;;  %v3162_v40 = vld [vmem:[#allocation2 + $0x31c] ss:$12 sps:$4 sm:$0xff]  }
 0x1ee   :  { %890 = vmatmul.mubr.bf16.gmra.mrb[52].mxu0 %v655_v24  ;;  %2911 = vmatprep.mubr.bf16.mxu1 %v656_v63  ;;  %v528_v48 = vadd.f32 %v3470_v10, %v527_v46  ;;  %v2870_v49 = vpop.f32.mrb[42].mxu0 }
 0x1ef   :  { %2912 = vmatmul.mubr.bf16.gmra.mrb[20].mxu1 %v657_v42  ;;  %v632_v50 = vmax.f32 %v536_v45, 0.0  ;;  %v539_v51 = vadd.f32 %v2870_v49, %v3470_v10  ;;  %v530_v52 = vpop.f32.mrb[43].mxu0  ;;  %899 = vmatprep.mubr.bf16.mxu0 %v3280_v0  ;;  %v3165_v49 = vld [vmem:[#allocation2 + $0x334] ss:$12 sps:$4 sm:$0xff]  }
 0x1f0   :  { %v630_v53 = vmax.f32 %v528_v48, 0.0  ;;  %v531_v54 = vadd.f32 %v3470_v10, %v530_v52  ;;  %1650 = vmatpush1.bf16.msra.mxu1 %v3139_v44 }
 0x1f1   :  { %v633_v56 = vmax.f32 %v539_v51, 0.0  ;;  %1651 = vmatprep.subr.bf16.mxu1 %v3144_v47  ;;  %v3160_v47 = vld [vmem:[#allocation2 + $0x318] ss:$12 sps:$4 sm:$0xff]  }
 0x1f2   :  { %v631_v58 = vmax.f32 %v531_v54, 0.0  ;;  %v3163_v54 = vld [vmem:[#allocation2 + $0x330] ss:$12 sps:$4 sm:$0xff]  }
 0x1f3   :  { %v3486_v59 = vpack.c.bf16 %v633_v56, %v632_v50 }
 0x1f4   :  { %v658_v60 = vpack.c.bf16 %v631_v58, %v630_v53  ;;  %v2873_v61 = vpop.f32.mrb[44].mxu0  ;;  %1652 = vmatpush1.bf16.msra.mxu1 %v3142_v55 }
 0x1f5   :  { %v552_v1 = vadd.f32 %v2873_v61, %v3470_v10  ;;  %v543_v2 = vpop.f32.mrb[45].mxu0  ;;  %1653 = vmatprep.subr.bf16.mxu1 %v3147_v57  ;;  %v3168_v57 = vld [vmem:[#allocation2 + $0x34c] ss:$12 sps:$4 sm:$0xff]  }
 0x1f6   :  { %900 = vmatmul.mubr.bf16.gmra.mrb[56].mxu0 %v656_v63  ;;  %2915 = vmatprep.mubr.bf16.mxu1 %v658_v60  ;;  %v544_v4 = vadd.f32 %v3470_v10, %v543_v2  ;;  %v2874_v5 = vpop.f32.mrb[46].mxu0 }
 0x1f7   :  { %2916 = vmatmul.mubr.bf16.gmra.mrb[24].mxu1 %v3486_v59  ;;  %909 = vmatprep.mubr.bf16.mxu0 %v3280_v0  ;;  %v636_v6 = vmax.f32 %v552_v1, 0.0  ;;  %v555_v7 = vadd.f32 %v2874_v5, %v3470_v10  ;;  %v546_v8 = vpop.f32.mrb[47].mxu0 }
 0x1f8   :  { %v634_v9 = vmax.f32 %v544_v4, 0.0  ;;  %v547_v11 = vadd.f32 %v3470_v10, %v546_v8  ;;  %1654 = vmatpush1.bf16.msra.mxu1 %v3145_v62  ;;  %v3166_v4 = vld [vmem:[#allocation2 + $0x348] ss:$12 sps:$4 sm:$0xff]  }
 0x1f9   :  { %v637_v13 = vmax.f32 %v555_v7, 0.0  ;;  %1655 = vmatprep.subr.bf16.mxu1 %v3150_v3 }
 0x1fa   :  { %v635_v15 = vmax.f32 %v547_v11, 0.0  ;;  %v3169_v11 = vld [vmem:[#allocation2 + $0x360] ss:$12 sps:$4 sm:$0xff]  }
 0x1fb   :  { %v3494_v16 = vpack.c.bf16 %v637_v13, %v636_v6 }
 0x1fc   :  { %v3496_v17 = vpack.c.bf16 %v635_v15, %v634_v9  ;;  %v2877_v18 = vpop.f32.mrb[0].mxu1  ;;  %1656 = vmatpush1.bf16.msra.mxu1 %v3148_v12 }
 0x1fd   :  { %v568_v20 = vadd.f32 %v2877_v18, %v3470_v10  ;;  %v559_v21 = vpop.f32.mrb[1].mxu1  ;;  %1657 = vmatprep.subr.bf16.mxu1 %v3153_v14  ;;  %v3174_v14 = vld [vmem:[#allocation2 + $0x37c] ss:$12 sps:$4 sm:$0xff]  }
 0x1fe   :  { %910 = vmatmul.mubr.bf16.gmra.mrb[60].mxu0 %v657_v42  ;;  %2919 = vmatprep.mubr.bf16.mxu1 %v3496_v17  ;;  %v560_v23 = vadd.f32 %v3470_v10, %v559_v21  ;;  %v2878_v24 = vpop.f32.mrb[2].mxu1 }
 0x1ff   :  { %919 = vmatprep.mubr.bf16.mxu0 %v3280_v0  ;;  %2920 = vmatmul.mubr.bf16.gmra.mrb[28].mxu1 %v3494_v16  ;;  %v640_v25 = vmax.f32 %v568_v20, 0.0  ;;  %v571_v26 = vadd.f32 %v2878_v24, %v3470_v10  ;;  %v562_v27 = vpop.f32.mrb[3].mxu1  ;;  %v3172_v24 = vld [vmem:[#allocation2 + $0x378] ss:$12 sps:$4 sm:$0xff]  }
 0x200   :  { %v638_v28 = vmax.f32 %v560_v23, 0.0  ;;  %v563_v29 = vadd.f32 %v3470_v10, %v562_v27  ;;  %1658 = vmatpush1.bf16.msra.mxu1 %v3151_v19 }
 0x201   :  { %v641_v31 = vmax.f32 %v571_v26, 0.0  ;;  %1659 = vmatprep.subr.bf16.mxu1 %v3156_v22 }
 0x202   :  { %v639_v33 = vmax.f32 %v563_v29, 0.0  ;;  %v3178_v29 = vld [vmem:[#allocation2 + $0x3a8] ss:$12 sps:$4 sm:$0xff]  }
 0x203   :  { %v3505_v34 = vpack.c.bf16 %v641_v31, %v640_v25  ;;  %v704_v31 = vlaneseq }
 0x204   :  { %v3507_v35 = vpack.c.bf16 %v639_v33, %v638_v28  ;;  %v2881_v36 = vpop.f32.mrb[4].mxu1  ;;  %1660 = vmatpush1.bf16.msra.mxu1 %v3154_v30  ;;  %v3175_v28 = vld [vmem:[#allocation2 + $0x390] ss:$12 sps:$4 sm:$0xff]  }
 0x205   :  { %v584_v38 = vadd.f32 %v2881_v36, %v3470_v10  ;;  %v575_v39 = vpop.f32.mrb[5].mxu1  ;;  %1661 = vmatprep.subr.bf16.mxu1 %v3159_v32  ;;  %v3183_v30 = vld [vmem:[#allocation2 + $0x3c4] ss:$12 sps:$4 sm:$0xff]   ;;  %v705_v32 = vshrl.u32 %v704_v31, 7 }
 0x206   :  { %920 = vmatmul.mubr.bf16.gmra.mrb[64].mxu0 %v658_v60  ;;  %2923 = vmatprep.mubr.bf16.mxu1 %v3507_v35  ;;  %v576_v41 = vadd.f32 %v3470_v10, %v575_v39  ;;  %v2882_v42 = vpop.f32.mrb[6].mxu1 }
 0x207   :  { %929 = vmatprep.mubr.bf16.mxu0 %v3280_v0  ;;  %2924 = vmatmul.mubr.bf16.gmra.mrb[32].mxu1 %v3505_v34  ;;  %v644_v63 = vmax.f32 %v584_v38, 0.0  ;;  %v587_v43 = vadd.f32 %v2882_v42, %v3470_v10  ;;  %v578_v44 = vpop.f32.mrb[7].mxu1  ;;  %v3543_v33 = vsub.s32 0, %v705_v32  ;;  %v714_v36 = vsub.s32 2, %v705_v32 }
 0x208   :  { %v642_v45 = vmax.f32 %v576_v41, 0.0  ;;  %v579_v46 = vadd.f32 %v3470_v10, %v578_v44  ;;  %1662 = vmatpush1.bf16.msra.mxu1 %v3157_v37 }
 0x209   :  { %v645_v48 = vmax.f32 %v587_v43, 0.0  ;;  %1663 = vmatprep.subr.bf16.mxu1 %v3162_v40 }
 0x20a   :  { %v643_v50 = vmax.f32 %v579_v46, 0.0 }
 0x20b   :  { %v3516_v51 = vpack.c.bf16 %v645_v48, %v644_v63 }
 0x20c   :  { %v664_v52 = vpack.c.bf16 %v643_v50, %v642_v45  ;;  %v2885_v53 = vpop.f32.mrb[8].mxu1  ;;  %1664 = vmatpush1.bf16.msra.mxu1 %v3160_v47 }
 0x20d   :  { %v600_v55 = vadd.f32 %v2885_v53, %v3470_v10  ;;  %v591_v56 = vpop.f32.mrb[9].mxu1  ;;  %1665 = vmatprep.subr.bf16.mxu1 %v3165_v49 }
 0x20e   :  { %930 = vmatmul.mubr.bf16.gmra.mrb[68].mxu0 %v3486_v59  ;;  %2927 = vmatprep.mubr.bf16.mxu1 %v664_v52  ;;  %v592_v58 = vadd.f32 %v3470_v10, %v591_v56  ;;  %v2886_v60 = vpop.f32.mrb[10].mxu1  ;;  %v3171_v59 = vld [vmem:[#allocation2 + $0x364] ss:$12 sps:$4 sm:$0xff]  }
 0x20f   :  { %939 = vmatprep.mubr.bf16.mxu0 %v3280_v0  ;;  %2928 = vmatmul.mubr.bf16.gmra.mrb[36].mxu1 %v3516_v51  ;;  %v648_v61 = vmax.f32 %v600_v55, 0.0  ;;  %v603_v62 = vadd.f32 %v2886_v60, %v3470_v10  ;;  %v594_v1 = vpop.f32.mrb[11].mxu1 }
 0x210   :  { %v646_v2 = vmax.f32 %v592_v58, 0.0  ;;  %v595_v3 = vadd.f32 %v3470_v10, %v594_v1  ;;  %1666 = vmatpush1.bf16.msra.mxu1 %v3163_v54 }
 0x211   :  { %v649_v5 = vmax.f32 %v603_v62, 0.0  ;;  %1667 = vmatprep.subr.bf16.mxu1 %v3168_v57 }
 0x212   :  { %v647_v6 = vmax.f32 %v595_v3, 0.0 }
 0x213   :  { %v667_v7 = vpack.c.bf16 %v649_v5, %v648_v61 }
 0x214   :  { %v666_v8 = vpack.c.bf16 %v647_v6, %v646_v2  ;;  %v2889_v9 = vpop.f32.mrb[12].mxu1  ;;  %1668 = vmatpush1.bf16.msra.mxu1 %v3166_v4 }
 0x215   :  { %v616_v12 = vadd.f32 %v2889_v9, %v3470_v10  ;;  %v607_v13 = vpop.f32.mrb[13].mxu1  ;;  %1669 = vmatprep.subr.bf16.mxu1 %v3171_v59  ;;  %v3181_v59 = vld [vmem:[#allocation2 + $0x3c0] ss:$12 sps:$4 sm:$0xff]  }
 0x216   :  { %940 = vmatmul.mubr.bf16.gmra.mrb[72].mxu0 %v3496_v17  ;;  %2931 = vmatprep.mubr.bf16.mxu1 %v666_v8  ;;  %v608_v15 = vadd.f32 %v3470_v10, %v607_v13  ;;  %v2890_v18 = vpop.f32.mrb[14].mxu1 }
 0x217   :  { %949 = vmatprep.mubr.bf16.mxu0 %v3280_v0  ;;  %2932 = vmatmul.mubr.bf16.gmra.mrb[40].mxu1 %v667_v7  ;;  %v652_v19 = vmax.f32 %v616_v12, 0.0  ;;  %v619_v20 = vadd.f32 %v2890_v18, %v3470_v10  ;;  %v610_v21 = vpop.f32.mrb[15].mxu1 }
 0x218   :  { %v650_v22 = vmax.f32 %v608_v15, 0.0  ;;  %v611_v23 = vadd.f32 %v3470_v10, %v610_v21  ;;  %1670 = vmatpush1.bf16.msra.mxu1 %v3169_v11  ;;  %v3177_v10 = vld [vmem:[#allocation2 + $0x394] ss:$12 sps:$4 sm:$0xff]   ;;  %v3186_v11 = vld [vmem:[#allocation2 + $0x3dc] ss:$12 sps:$4 sm:$0xff]  }
 0x219   :  { %v653_v25 = vmax.f32 %v619_v20, 0.0  ;;  %1671 = vmatprep.subr.bf16.mxu1 %v3174_v14 }
 0x21a   :  { %v651_v26 = vmax.f32 %v611_v23, 0.0 }
 0x21b   :  { %v669_v17 = vpack.c.bf16 %v653_v25, %v652_v19  ;;  %v3184_v25 = vld [vmem:[#allocation2 + $0x3d8] ss:$12 sps:$4 sm:$0xff]  }
 0x21c   :  { %v668_v27 = vpack.c.bf16 %v651_v26, %v650_v22  ;;  %1672 = vmatpush1.bf16.msra.mxu1 %v3172_v24 }
 0x21d   :  { %1673 = vmatprep.subr.bf16.mxu1 %v3177_v10  ;;  %v3189_v10 = vld [vmem:[#allocation2 + $0x3f4] ss:$12 sps:$4 sm:$0xff]  }
 0x21e   :  { %950 = vmatmul.mubr.bf16.gmra.mrb[76].mxu0 %v3494_v16  ;;  %2935 = vmatprep.mubr.bf16.mxu1 %v668_v27  ;;  %v3180_v16 = vld [vmem:[#allocation2 + $0x3ac] ss:$12 sps:$4 sm:$0xff]  }
 0x21f   :  { %959 = vmatprep.mubr.bf16.mxu0 %v3280_v0  ;;  %2936 = vmatmul.mubr.bf16.gmra.mrb[44].mxu1 %v669_v17 }
 0x220   :  { %1674 = vmatpush1.bf16.msra.mxu1 %v3175_v28 }
 0x221   :  { %1675 = vmatprep.subr.bf16.mxu1 %v3180_v16 }
 0x224   :  { %1676 = vmatpush1.bf16.msra.mxu1 %v3178_v29 }
 0x225   :  { %1838 = vmatprep.subr.bf16.mxu1 %v3183_v30 }
 0x226   :  { %960 = vmatmul.mubr.bf16.gmra.mrb[80].mxu0 %v3507_v35  ;;  %v3548_v35 = vsub.s32 1, %v705_v32 }
 0x227   :  { %969 = vmatprep.mubr.bf16.mxu0 %v3280_v0 }
 0x22e   :  { %970 = vmatmul.mubr.bf16.gmra.mrb[84].mxu0 %v3505_v34  ;;  %v702_v34 = vld [vmem:[%s4058_s2 + $0x2] sm:$0x7] }
 0x22f   :  { %979 = vmatprep.mubr.bf16.mxu0 %v3280_v0  ;;  %v3551_v37 = vrot.slane %v702_v34, %v3543_v33  ;;  %v3554_v38 = vrot.slane %v702_v34, %v3548_v35  ;;  %v3556_v39 = vrot.slane %v702_v34, %v714_v36 }
 0x236   :  { %980 = vmatmul.mubr.bf16.gmra.mrb[88].mxu0 %v664_v52 }
 0x237   :  { %989 = vmatprep.mubr.bf16.mxu0 %v3280_v0 }
 0x23e   :  { %990 = vmatmul.mubr.bf16.gmra.mrb[92].mxu0 %v3516_v51 }
 0x23f   :  { %999 = vmatprep.mubr.bf16.mxu0 %v3280_v0 }
 0x246   :  { %1000 = vmatmul.mubr.bf16.gmra.mrb[96].mxu0 %v666_v8 }
 0x247   :  { %1009 = vmatprep.mubr.bf16.mxu0 %v3280_v0 }
 0x24e   :  { %1010 = vmatmul.mubr.bf16.gmra.mrb[100].mxu0 %v667_v7 }
 0x24f   :  { %1019 = vmatprep.mubr.bf16.mxu0 %v3280_v0 }
 0x256   :  { %1020 = vmatmul.mubr.bf16.gmra.mrb[104].mxu0 %v668_v27 }
 0x257   :  { %1029 = vmatprep.mubr.bf16.mxu0 %v3280_v0 }
 0x25e   :  { %1030 = vmatmul.mubr.bf16.gmra.mrb[108].mxu0 %v669_v17 }
 0x2b9   :  { %v881_v40 = vpop.f32.mrb[48].mxu0 }
 0x2ba   :  { %v882_v41 = vadd.f32 %v881_v40, %v3551_v37  ;;  %v883_v42 = vpop.f32.mrb[49].mxu0  ;;  %v2909_v63 = vpop.f32.mrb[16].mxu1 }
 0x2bb   :  { %v884_v43 = vadd.f32 %v883_v42, %v3554_v38  ;;  %v1083_v44 = vadd.f32 %v2909_v63, %v3556_v39  ;;  %v885_v45 = vpop.f32.mrb[50].mxu0  ;;  %v1074_v46 = vpop.f32.mrb[17].mxu1  ;;  %v3187_v42 = vld [vmem:[#allocation2 + $0x3f0] ss:$12 sps:$4 sm:$0xff]  }
 0x2bc   :  { %v886_v47 = vadd.f32 %v885_v45, %v3551_v37  ;;  %v1075_v48 = vadd.f32 %v1074_v46, %v3556_v39  ;;  %v887_v49 = vpop.f32.mrb[51].mxu0  ;;  %v2910_v50 = vpop.f32.mrb[18].mxu1  ;;  %v1201_v54 = vmax.f32 %v882_v41, 0.0  ;;  %v3192_v46 = vld [vmem:[#allocation2 + $0x40c] ss:$12 sps:$4 sm:$0xff]  }
 0x2bd   :  { %v888_v51 = vadd.f32 %v887_v49, %v3554_v38  ;;  %v1086_v52 = vadd.f32 %v2910_v50, %v3556_v39  ;;  %v1077_v53 = vpop.f32.mrb[19].mxu1  ;;  %v1202_v57 = vmax.f32 %v884_v43, 0.0  ;;  %v1209_v58 = vmax.f32 %v1083_v44, 0.0 }
 0x2be   :  { %v1204_v55 = vmax.f32 %v886_v47, 0.0  ;;  %v1078_v56 = vadd.f32 %v1077_v53, %v3556_v39  ;;  %v1203_v1 = vmax.f32 %v1075_v48, 0.0 }
 0x2bf   :  { %v1205_v60 = vmax.f32 %v888_v51, 0.0  ;;  %v1212_v61 = vmax.f32 %v1086_v52, 0.0 }
 0x2c0   :  { %v1297_v62 = vpack.c.bf16 %v1204_v55, %v1201_v54  ;;  %v1206_v2 = vmax.f32 %v1078_v56, 0.0 }
 0x2c1   :  { %v1298_v3 = vpack.c.bf16 %v1205_v60, %v1202_v57  ;;  %v3566_v4 = vpack.c.bf16 %v1212_v61, %v1209_v58  ;;  %v891_v5 = vpop.f32.mrb[52].mxu0  ;;  %v3190_v60 = vld [vmem:[#allocation2 + $0x408] ss:$12 sps:$4 sm:$0xff]  }
 0x2c2   :  { %v3568_v6 = vpack.c.bf16 %v1206_v2, %v1203_v1  ;;  %v892_v7 = vadd.f32 %v891_v5, %v3551_v37  ;;  %v893_v8 = vpop.f32.mrb[53].mxu0  ;;  %v2913_v9 = vpop.f32.mrb[20].mxu1 }
 0x2c3   :  { %v894_v12 = vadd.f32 %v893_v8, %v3554_v38  ;;  %v1099_v13 = vadd.f32 %v2913_v9, %v3556_v39  ;;  %v895_v14 = vpop.f32.mrb[54].mxu0  ;;  %v1090_v15 = vpop.f32.mrb[21].mxu1  ;;  %1677 = vmatprep.mubr.bf16.mxu1 %v1298_v3  ;;  %v3195_v3 = vld [vmem:[#allocation2 + $0x424] ss:$12 sps:$4 sm:$0xff]  }
 0x2c4   :  { %v896_v18 = vadd.f32 %v895_v14, %v3551_v37  ;;  %v1091_v19 = vadd.f32 %v1090_v15, %v3556_v39  ;;  %v897_v20 = vpop.f32.mrb[55].mxu0  ;;  %v2914_v21 = vpop.f32.mrb[22].mxu1  ;;  %1678 = vmatmul.mubr.bf16.vlgmr.msra.gmra.mrb[48].mxu1 %v1297_v62  ;;  %v1207_v26 = vmax.f32 %v892_v7, 0.0  ;;  %v3193_v14 = vld [vmem:[#allocation2 + $0x420] ss:$12 sps:$4 sm:$0xff]  }
 0x2c5   :  { %v898_v22 = vadd.f32 %v897_v20, %v3554_v38  ;;  %v1102_v23 = vadd.f32 %v2914_v21, %v3556_v39  ;;  %1839 = vmatpush1.bf16.msra.mxu1 %v3181_v59  ;;  %v1093_v24 = vpop.f32.mrb[23].mxu1  ;;  %v1208_v28 = vmax.f32 %v894_v12, 0.0  ;;  %v1221_v16 = vmax.f32 %v1099_v13, 0.0  ;;  %v3198_v21 = vld [vmem:[#allocation2 + $0x43c] ss:$12 sps:$4 sm:$0xff]  }
 0x2c6   :  { %v1210_v17 = vmax.f32 %v896_v18, 0.0  ;;  %v1094_v27 = vadd.f32 %v1093_v24, %v3556_v39  ;;  %1840 = vmatprep.subr.bf16.mxu1 %v3186_v11  ;;  %v1215_v32 = vmax.f32 %v1091_v19, 0.0 }
 0x2c7   :  { %v1211_v29 = vmax.f32 %v898_v22, 0.0  ;;  %v1224_v30 = vmax.f32 %v1102_v23, 0.0 }
 0x2c8   :  { %v1300_v31 = vpack.c.bf16 %v1210_v17, %v1207_v26  ;;  %v1218_v34 = vmax.f32 %v1094_v27, 0.0 }
 0x2c9   :  { %v1301_v36 = vpack.c.bf16 %v1211_v29, %v1208_v28  ;;  %v3578_v40 = vpack.c.bf16 %v1224_v30, %v1221_v16  ;;  %v901_v41 = vpop.f32.mrb[56].mxu0  ;;  %1841 = vmatpush1.bf16.msra.mxu1 %v3184_v25 }
 0x2ca   :  { %v3580_v63 = vpack.c.bf16 %v1218_v34, %v1215_v32  ;;  %v902_v43 = vadd.f32 %v901_v41, %v3551_v37  ;;  %v903_v44 = vpop.f32.mrb[57].mxu0  ;;  %v2917_v45 = vpop.f32.mrb[24].mxu1  ;;  %1842 = vmatprep.subr.bf16.mxu1 %v3189_v10 }
 0x2cb   :  { %v904_v47 = vadd.f32 %v903_v44, %v3554_v38  ;;  %v905_v48 = vpop.f32.mrb[58].mxu0  ;;  %1687 = vmatprep.mubr.bf16.mxu1 %v1301_v36  ;;  %v1115_v49 = vadd.f32 %v2917_v45, %v3556_v39  ;;  %v1106_v50 = vpop.f32.mrb[25].mxu1 }
 0x2cc   :  { %v906_v51 = vadd.f32 %v905_v48, %v3551_v37  ;;  %v907_v52 = vpop.f32.mrb[59].mxu0  ;;  %1688 = vmatmul.mubr.bf16.gmra.mrb[52].mxu1 %v1300_v31  ;;  %v1107_v53 = vadd.f32 %v1106_v50, %v3556_v39  ;;  %v2918_v54 = vpop.f32.mrb[26].mxu1  ;;  %v1213_v61 = vmax.f32 %v902_v43, 0.0  ;;  %v3196_v31 = vld [vmem:[#allocation2 + $0x438] ss:$12 sps:$4 sm:$0xff]  }
 0x2cd   :  { %v908_v55 = vadd.f32 %v907_v52, %v3554_v38  ;;  %v1233_v56 = vmax.f32 %v1115_v49, 0.0  ;;  %v1118_v57 = vadd.f32 %v2918_v54, %v3556_v39  ;;  %v1109_v58 = vpop.f32.mrb[27].mxu1  ;;  %1843 = vmatpush1.bf16.msra.mxu1 %v3187_v42  ;;  %v1214_v5 = vmax.f32 %v904_v47, 0.0  ;;  %v3201_v42 = vld [vmem:[#allocation2 + $0x454] ss:$12 sps:$4 sm:$0xff]  }
 0x2ce   :  { %v1216_v62 = vmax.f32 %v906_v51, 0.0  ;;  %v1227_v1 = vmax.f32 %v1107_v53, 0.0  ;;  %v1110_v2 = vadd.f32 %v1109_v58, %v3556_v39  ;;  %1844 = vmatprep.subr.bf16.mxu1 %v3192_v46  ;;  %v3199_v51 = vld [vmem:[#allocation2 + $0x450] ss:$12 sps:$4 sm:$0xff]  }
 0x2cf   :  { %v1217_v59 = vmax.f32 %v908_v55, 0.0  ;;  %v1236_v7 = vmax.f32 %v1118_v57, 0.0 }
 0x2d0   :  { %v1303_v8 = vpack.c.bf16 %v1216_v62, %v1213_v61  ;;  %v1230_v9 = vmax.f32 %v1110_v2, 0.0 }
 0x2d1   :  { %v1304_v11 = vpack.c.bf16 %v1217_v59, %v1214_v5  ;;  %v911_v12 = vpop.f32.mrb[60].mxu0  ;;  %v3590_v13 = vpack.c.bf16 %v1236_v7, %v1233_v56  ;;  %1845 = vmatpush1.bf16.msra.mxu1 %v3190_v60  ;;  %v3204_v56 = vld [vmem:[#allocation2 + $0x46c] ss:$12 sps:$4 sm:$0xff]  }
 0x2d2   :  { %v912_v15 = vadd.f32 %v911_v12, %v3551_v37  ;;  %v913_v18 = vpop.f32.mrb[61].mxu0  ;;  %v3593_v19 = vpack.c.bf16 %v1230_v9, %v1227_v1  ;;  %v2921_v20 = vpop.f32.mrb[28].mxu1  ;;  %1846 = vmatprep.subr.bf16.mxu1 %v3195_v3  ;;  %v3202_v9 = vld [vmem:[#allocation2 + $0x468] ss:$12 sps:$4 sm:$0xff]  }
 0x2d3   :  { %v914_v22 = vadd.f32 %v913_v18, %v3554_v38  ;;  %v915_v23 = vpop.f32.mrb[62].mxu0  ;;  %1697 = vmatprep.mubr.bf16.mxu1 %v1304_v11  ;;  %v1131_v24 = vadd.f32 %v2921_v20, %v3556_v39  ;;  %v1122_v25 = vpop.f32.mrb[29].mxu1 }
 0x2d4   :  { %v916_v26 = vadd.f32 %v915_v23, %v3551_v37  ;;  %v917_v17 = vpop.f32.mrb[63].mxu0  ;;  %1698 = vmatmul.mubr.bf16.gmra.mrb[56].mxu1 %v1303_v8  ;;  %v1123_v27 = vadd.f32 %v1122_v25, %v3556_v39  ;;  %v2922_v10 = vpop.f32.mrb[30].mxu1  ;;  %v1219_v32 = vmax.f32 %v912_v15, 0.0 }
 0x2d5   :  { %v918_v28 = vadd.f32 %v917_v17, %v3554_v38  ;;  %v1245_v16 = vmax.f32 %v1131_v24, 0.0  ;;  %v1134_v29 = vadd.f32 %v2922_v10, %v3556_v39  ;;  %v1125_v30 = vpop.f32.mrb[31].mxu1  ;;  %1847 = vmatpush1.bf16.msra.mxu1 %v3193_v14  ;;  %v1220_v43 = vmax.f32 %v914_v22, 0.0 }
 0x2d6   :  { %v1222_v34 = vmax.f32 %v916_v26, 0.0  ;;  %v1239_v36 = vmax.f32 %v1123_v27, 0.0  ;;  %v1126_v41 = vadd.f32 %v1125_v30, %v3556_v39  ;;  %1848 = vmatprep.subr.bf16.mxu1 %v3198_v21 }
 0x2d7   :  { %v1223_v44 = vmax.f32 %v918_v28, 0.0  ;;  %v1248_v45 = vmax.f32 %v1134_v29, 0.0 }
 0x2d8   :  { %v1306_v46 = vpack.c.bf16 %v1222_v34, %v1219_v32  ;;  %v1242_v47 = vmax.f32 %v1126_v41, 0.0 }
 0x2d9   :  { %v1307_v48 = vpack.c.bf16 %v1223_v44, %v1220_v43  ;;  %v921_v49 = vpop.f32.mrb[64].mxu0  ;;  %v3602_v50 = vpack.c.bf16 %v1248_v45, %v1245_v16  ;;  %1849 = vmatpush1.bf16.msra.mxu1 %v3196_v31 }
 0x2da   :  { %v922_v52 = vadd.f32 %v921_v49, %v3551_v37  ;;  %v923_v53 = vpop.f32.mrb[65].mxu0  ;;  %v3605_v54 = vpack.c.bf16 %v1242_v47, %v1239_v36  ;;  %v2925_v55 = vpop.f32.mrb[32].mxu1  ;;  %1850 = vmatprep.subr.bf16.mxu1 %v3201_v42 }
 0x2db   :  { %v924_v57 = vadd.f32 %v923_v53, %v3554_v38  ;;  %v925_v58 = vpop.f32.mrb[66].mxu0  ;;  %1707 = vmatprep.mubr.bf16.mxu1 %v1307_v48  ;;  %v1147_v60 = vadd.f32 %v2925_v55, %v3556_v39  ;;  %v1138_v61 = vpop.f32.mrb[33].mxu1 }
 0x2dc   :  { %v926_v62 = vadd.f32 %v925_v58, %v3551_v37  ;;  %v927_v1 = vpop.f32.mrb[67].mxu0  ;;  %1708 = vmatmul.mubr.bf16.gmra.mrb[60].mxu1 %v1306_v46  ;;  %v1139_v2 = vadd.f32 %v1138_v61, %v3556_v39  ;;  %v2926_v3 = vpop.f32.mrb[34].mxu1  ;;  %v1225_v11 = vmax.f32 %v922_v52, 0.0 }
 0x2dd   :  { %v928_v5 = vadd.f32 %v927_v1, %v3554_v38  ;;  %v1257_v59 = vmax.f32 %v1147_v60, 0.0  ;;  %v1150_v7 = vadd.f32 %v2926_v3, %v3556_v39  ;;  %v1141_v8 = vpop.f32.mrb[35].mxu1  ;;  %1851 = vmatpush1.bf16.msra.mxu1 %v3199_v51  ;;  %v1226_v18 = vmax.f32 %v924_v57, 0.0 }
 0x2de   :  { %v1228_v12 = vmax.f32 %v926_v62, 0.0  ;;  %v1251_v14 = vmax.f32 %v1139_v2, 0.0  ;;  %v1142_v15 = vadd.f32 %v1141_v8, %v3556_v39  ;;  %1852 = vmatprep.subr.bf16.mxu1 %v3204_v56 }
 0x2df   :  { %v1229_v20 = vmax.f32 %v928_v5, 0.0  ;;  %v1260_v21 = vmax.f32 %v1150_v7, 0.0 }
 0x2e0   :  { %v1309_v22 = vpack.c.bf16 %v1228_v12, %v1225_v11  ;;  %v1254_v23 = vmax.f32 %v1142_v15, 0.0 }
 0x2e1   :  { %v1310_v24 = vpack.c.bf16 %v1229_v20, %v1226_v18  ;;  %v931_v25 = vpop.f32.mrb[68].mxu0  ;;  %v3614_v26 = vpack.c.bf16 %v1260_v21, %v1257_v59  ;;  %1853 = vmatpush1.bf16.msra.mxu1 %v3202_v9 }
 0x2e2   :  { %v932_v17 = vadd.f32 %v931_v25, %v3551_v37  ;;  %v933_v27 = vpop.f32.mrb[69].mxu0  ;;  %v3617_v10 = vpack.c.bf16 %v1254_v23, %v1251_v14  ;;  %v2929_v28 = vpop.f32.mrb[36].mxu1 }
 0x2e3   :  { %v934_v16 = vadd.f32 %v933_v27, %v3554_v38  ;;  %v935_v29 = vpop.f32.mrb[70].mxu0  ;;  %1717 = vmatprep.mubr.bf16.mxu1 %v1310_v24  ;;  %v1163_v30 = vadd.f32 %v2929_v28, %v3556_v39  ;;  %v1154_v31 = vpop.f32.mrb[37].mxu1 }
 0x2e4   :  { %v936_v32 = vadd.f32 %v935_v29, %v3551_v37  ;;  %v937_v34 = vpop.f32.mrb[71].mxu0  ;;  %1718 = vmatmul.mubr.bf16.gmra.mrb[64].mxu1 %v1309_v22  ;;  %v1155_v36 = vadd.f32 %v1154_v31, %v3556_v39  ;;  %v2930_v41 = vpop.f32.mrb[38].mxu1  ;;  %v1231_v46 = vmax.f32 %v932_v17, 0.0 }
 0x2e5   :  { %v938_v42 = vadd.f32 %v937_v34, %v3554_v38  ;;  %v1269_v43 = vmax.f32 %v1163_v30, 0.0  ;;  %v1166_v44 = vadd.f32 %v2930_v41, %v3556_v39  ;;  %v1157_v45 = vpop.f32.mrb[39].mxu1  ;;  %v1232_v51 = vmax.f32 %v934_v16, 0.0 }
 0x2e6   :  { %v1234_v47 = vmax.f32 %v936_v32, 0.0  ;;  %v1263_v48 = vmax.f32 %v1155_v36, 0.0  ;;  %v1158_v49 = vadd.f32 %v1157_v45, %v3556_v39 }
 0x2e7   :  { %v1235_v52 = vmax.f32 %v938_v42, 0.0  ;;  %v1272_v53 = vmax.f32 %v1166_v44, 0.0 }
 0x2e8   :  { %v1312_v55 = vpack.c.bf16 %v1234_v47, %v1231_v46  ;;  %v1266_v56 = vmax.f32 %v1158_v49, 0.0 }
 0x2e9   :  { %v1313_v57 = vpack.c.bf16 %v1235_v52, %v1232_v51  ;;  %v941_v58 = vpop.f32.mrb[72].mxu0  ;;  %v3626_v60 = vpack.c.bf16 %v1272_v53, %v1269_v43 }
 0x2ea   :  { %v942_v61 = vadd.f32 %v941_v58, %v3551_v37  ;;  %v943_v62 = vpop.f32.mrb[73].mxu0  ;;  %v3629_v1 = vpack.c.bf16 %v1266_v56, %v1263_v48  ;;  %v2933_v2 = vpop.f32.mrb[40].mxu1 }
 0x2eb   :  { %v944_v3 = vadd.f32 %v943_v62, %v3554_v38  ;;  %v945_v5 = vpop.f32.mrb[74].mxu0  ;;  %1727 = vmatprep.mubr.bf16.mxu1 %v1313_v57  ;;  %v1179_v59 = vadd.f32 %v2933_v2, %v3556_v39  ;;  %v1170_v7 = vpop.f32.mrb[41].mxu1 }
 0x2ec   :  { %v946_v8 = vadd.f32 %v945_v5, %v3551_v37  ;;  %v947_v9 = vpop.f32.mrb[75].mxu0  ;;  %1728 = vmatmul.mubr.bf16.gmra.mrb[68].mxu1 %v1312_v55  ;;  %v1171_v11 = vadd.f32 %v1170_v7, %v3556_v39  ;;  %v2934_v12 = vpop.f32.mrb[42].mxu1  ;;  %v1237_v21 = vmax.f32 %v942_v61, 0.0 }
 0x2ed   :  { %v948_v14 = vadd.f32 %v947_v9, %v3554_v38  ;;  %v1281_v15 = vmax.f32 %v1179_v59, 0.0  ;;  %v1182_v18 = vadd.f32 %v2934_v12, %v3556_v39  ;;  %v1173_v20 = vpop.f32.mrb[43].mxu1  ;;  %v1238_v25 = vmax.f32 %v944_v3, 0.0 }
 0x2ee   :  { %v1240_v22 = vmax.f32 %v946_v8, 0.0  ;;  %v1275_v23 = vmax.f32 %v1171_v11, 0.0  ;;  %v1174_v24 = vadd.f32 %v1173_v20, %v3556_v39 }
 0x2ef   :  { %v1241_v17 = vmax.f32 %v948_v14, 0.0  ;;  %v1284_v27 = vmax.f32 %v1182_v18, 0.0 }
 0x2f0   :  { %v1315_v28 = vpack.c.bf16 %v1240_v22, %v1237_v21  ;;  %v1278_v16 = vmax.f32 %v1174_v24, 0.0 }
 0x2f1   :  { %v1316_v29 = vpack.c.bf16 %v1241_v17, %v1238_v25  ;;  %v951_v30 = vpop.f32.mrb[76].mxu0  ;;  %v3638_v31 = vpack.c.bf16 %v1284_v27, %v1281_v15 }
 0x2f2   :  { %v952_v32 = vadd.f32 %v951_v30, %v3551_v37  ;;  %v953_v34 = vpop.f32.mrb[77].mxu0  ;;  %v3641_v36 = vpack.c.bf16 %v1278_v16, %v1275_v23  ;;  %v2937_v41 = vpop.f32.mrb[44].mxu1 }
 0x2f3   :  { %v954_v42 = vadd.f32 %v953_v34, %v3554_v38  ;;  %v955_v43 = vpop.f32.mrb[78].mxu0  ;;  %1737 = vmatprep.mubr.bf16.mxu1 %v1316_v29  ;;  %v1195_v44 = vadd.f32 %v2937_v41, %v3556_v39  ;;  %v1186_v45 = vpop.f32.mrb[45].mxu1 }
 0x2f4   :  { %v956_v46 = vadd.f32 %v955_v43, %v3551_v37  ;;  %v957_v47 = vpop.f32.mrb[79].mxu0  ;;  %1738 = vmatmul.mubr.bf16.gmra.mrb[72].mxu1 %v1315_v28  ;;  %v1187_v48 = vadd.f32 %v1186_v45, %v3556_v39  ;;  %v2938_v49 = vpop.f32.mrb[46].mxu1  ;;  %v1243_v56 = vmax.f32 %v952_v32, 0.0 }
 0x2f5   :  { %v958_v51 = vadd.f32 %v957_v47, %v3554_v38  ;;  %v1293_v52 = vmax.f32 %v1195_v44, 0.0  ;;  %v1198_v53 = vadd.f32 %v2938_v49, %v3556_v39  ;;  %v1189_v55 = vpop.f32.mrb[47].mxu1  ;;  %v1244_v62 = vmax.f32 %v954_v42, 0.0 }
 0x2f6   :  { %v1246_v57 = vmax.f32 %v956_v46, 0.0  ;;  %v1287_v58 = vmax.f32 %v1187_v48, 0.0  ;;  %v1190_v61 = vadd.f32 %v1189_v55, %v3556_v39 }
 0x2f7   :  { %v1247_v2 = vmax.f32 %v958_v51, 0.0  ;;  %v1296_v3 = vmax.f32 %v1198_v53, 0.0 }
 0x2f8   :  { %v1318_v5 = vpack.c.bf16 %v1246_v57, %v1243_v56  ;;  %v1290_v59 = vmax.f32 %v1190_v61, 0.0 }
 0x2f9   :  { %v1319_v7 = vpack.c.bf16 %v1247_v2, %v1244_v62  ;;  %v961_v8 = vpop.f32.mrb[80].mxu0  ;;  %v3650_v9 = vpack.c.bf16 %v1296_v3, %v1293_v52 }
 0x2fa   :  { %v962_v11 = vadd.f32 %v961_v8, %v3551_v37  ;;  %v963_v12 = vpop.f32.mrb[81].mxu0  ;;  %v3653_v14 = vpack.c.bf16 %v1290_v59, %v1287_v58 }
 0x2fb   :  { %v964_v15 = vadd.f32 %v963_v12, %v3554_v38  ;;  %v965_v18 = vpop.f32.mrb[82].mxu0  ;;  %1747 = vmatprep.mubr.bf16.mxu1 %v1319_v7 }
 0x2fc   :  { %v966_v39 = vadd.f32 %v965_v18, %v3551_v37  ;;  %v967_v20 = vpop.f32.mrb[83].mxu0  ;;  %1748 = vmatmul.mubr.bf16.gmra.mrb[76].mxu1 %v1318_v5  ;;  %v1249_v22 = vmax.f32 %v962_v11, 0.0 }
 0x2fd   :  { %v968_v21 = vadd.f32 %v967_v20, %v3554_v38  ;;  %v1250_v24 = vmax.f32 %v964_v15, 0.0 }
 0x2fe   :  { %v1252_v23 = vmax.f32 %v966_v39, 0.0 }
 0x2ff   :  { %v1253_v25 = vmax.f32 %v968_v21, 0.0 }
 0x300   :  { %v1321_v17 = vpack.c.bf16 %v1252_v23, %v1249_v22 }
 0x301   :  { %v1322_v27 = vpack.c.bf16 %v1253_v25, %v1250_v24  ;;  %v971_v28 = vpop.f32.mrb[84].mxu0 }
 0x302   :  { %v972_v16 = vadd.f32 %v971_v28, %v3551_v37  ;;  %v973_v29 = vpop.f32.mrb[85].mxu0 }
 0x303   :  { %v974_v30 = vadd.f32 %v973_v29, %v3554_v38  ;;  %v975_v32 = vpop.f32.mrb[86].mxu0  ;;  %1757 = vmatprep.mubr.bf16.mxu1 %v1322_v27 }
 0x304   :  { %v976_v34 = vadd.f32 %v975_v32, %v3551_v37  ;;  %v977_v41 = vpop.f32.mrb[87].mxu0  ;;  %1758 = vmatmul.mubr.bf16.gmra.mrb[80].mxu1 %v1321_v17  ;;  %v1255_v43 = vmax.f32 %v972_v16, 0.0 }
 0x305   :  { %v978_v42 = vadd.f32 %v977_v41, %v3554_v38  ;;  %v1256_v45 = vmax.f32 %v974_v30, 0.0  ;;  %v3205_v41 = vld [vmem:[#allocation2 + $0x480] ss:$12 sps:$4 sm:$0xff]  }
 0x306   :  { %v1258_v44 = vmax.f32 %v976_v34, 0.0 }
 0x307   :  { %v1259_v46 = vmax.f32 %v978_v42, 0.0  ;;  %v3207_v42 = vld [vmem:[#allocation2 + $0x484] ss:$12 sps:$4 sm:$0xff]  }
 0x308   :  { %v1324_v47 = vpack.c.bf16 %v1258_v44, %v1255_v43  ;;  %2331 = vmatprep.subr.bf16.mxu0 %v3207_v42 }
 0x309   :  { %v1325_v48 = vpack.c.bf16 %v1259_v46, %v1256_v45  ;;  %v981_v49 = vpop.f32.mrb[88].mxu0  ;;  %2332 = vmatpush1.bf16.msra.mxu0 %v3205_v41 }
 0x30a   :  { %v982_v51 = vadd.f32 %v981_v49, %v3551_v37  ;;  %v983_v52 = vpop.f32.mrb[89].mxu0 }
 0x30b   :  { %v984_v53 = vadd.f32 %v983_v52, %v3554_v38  ;;  %v985_v55 = vpop.f32.mrb[90].mxu0  ;;  %1767 = vmatprep.mubr.bf16.mxu1 %v1325_v48 }
 0x30c   :  { %v986_v56 = vadd.f32 %v985_v55, %v3551_v37  ;;  %v987_v57 = vpop.f32.mrb[91].mxu0  ;;  %1768 = vmatmul.mubr.bf16.gmra.mrb[84].mxu1 %v1324_v47  ;;  %v1261_v61 = vmax.f32 %v982_v51, 0.0 }
 0x30d   :  { %v988_v58 = vadd.f32 %v987_v57, %v3554_v38  ;;  %v1262_v2 = vmax.f32 %v984_v53, 0.0 }
 0x30e   :  { %v1264_v62 = vmax.f32 %v986_v56, 0.0 }
 0x30f   :  { %v1265_v3 = vmax.f32 %v988_v58, 0.0 }
 0x310   :  { %v1327_v5 = vpack.c.bf16 %v1264_v62, %v1261_v61  ;;  %v3208_v61 = vld [vmem:[#allocation2 + $0x498] ss:$12 sps:$4 sm:$0xff]   ;;  %v3210_v62 = vld [vmem:[#allocation2 + $0x49c] ss:$12 sps:$4 sm:$0xff]  }
 0x311   :  { %v1328_v59 = vpack.c.bf16 %v1265_v3, %v1262_v2  ;;  %v991_v7 = vpop.f32.mrb[92].mxu0  ;;  %2333 = vmatprep.subr.bf16.mxu0 %v3210_v62  ;;  %v3223_v62 = vld [vmem:[#allocation2 + $0x510] ss:$12 sps:$4 sm:$0xff]  }
 0x312   :  { %v992_v8 = vadd.f32 %v991_v7, %v3551_v37  ;;  %v993_v11 = vpop.f32.mrb[93].mxu0  ;;  %2334 = vmatpush1.bf16.msra.mxu0 %v3208_v61  ;;  %v3220_v61 = vld [vmem:[#allocation2 + $0x4f8] ss:$12 sps:$4 sm:$0xff]  }
 0x313   :  { %v994_v12 = vadd.f32 %v993_v11, %v3554_v38  ;;  %v995_v15 = vpop.f32.mrb[94].mxu0  ;;  %1777 = vmatprep.mubr.bf16.mxu1 %v1328_v59 }
 0x314   :  { %v996_v18 = vadd.f32 %v995_v15, %v3551_v37  ;;  %v997_v39 = vpop.f32.mrb[95].mxu0  ;;  %1778 = vmatmul.mubr.bf16.gmra.mrb[88].mxu1 %v1327_v5  ;;  %v1267_v21 = vmax.f32 %v992_v8, 0.0 }
 0x315   :  { %v998_v20 = vadd.f32 %v997_v39, %v3554_v38  ;;  %v1268_v23 = vmax.f32 %v994_v12, 0.0 }
 0x316   :  { %v1270_v22 = vmax.f32 %v996_v18, 0.0 }
 0x317   :  { %v1271_v24 = vmax.f32 %v998_v20, 0.0 }
 0x318   :  { %v1330_v25 = vpack.c.bf16 %v1270_v22, %v1267_v21 }
 0x319   :  { %v1331_v17 = vpack.c.bf16 %v1271_v24, %v1268_v23  ;;  %v1001_v27 = vpop.f32.mrb[96].mxu0  ;;  %v3211_v23 = vld [vmem:[#allocation2 + $0x4b0] ss:$12 sps:$4 sm:$0xff]   ;;  %v3213_v24 = vld [vmem:[#allocation2 + $0x4b4] ss:$12 sps:$4 sm:$0xff]  }
 0x31a   :  { %v1002_v28 = vadd.f32 %v1001_v27, %v3551_v37  ;;  %v1003_v16 = vpop.f32.mrb[97].mxu0  ;;  %2335 = vmatprep.subr.bf16.mxu0 %v3213_v24 }
 0x31b   :  { %v1004_v29 = vadd.f32 %v1003_v16, %v3554_v38  ;;  %v1005_v30 = vpop.f32.mrb[98].mxu0  ;;  %1787 = vmatprep.mubr.bf16.mxu1 %v1331_v17  ;;  %2336 = vmatpush1.bf16.msra.mxu0 %v3211_v23 }
 0x31c   :  { %v1006_v32 = vadd.f32 %v1005_v30, %v3551_v37  ;;  %v1007_v34 = vpop.f32.mrb[99].mxu0  ;;  %1788 = vmatmul.mubr.bf16.gmra.mrb[92].mxu1 %v1330_v25  ;;  %v1273_v44 = vmax.f32 %v1002_v28, 0.0 }
 0x31d   :  { %v1008_v43 = vadd.f32 %v1007_v34, %v3554_v38  ;;  %v1274_v46 = vmax.f32 %v1004_v29, 0.0 }
 0x31e   :  { %v1276_v45 = vmax.f32 %v1006_v32, 0.0 }
 0x31f   :  { %v1277_v47 = vmax.f32 %v1008_v43, 0.0 }
 0x320   :  { %v1333_v48 = vpack.c.bf16 %v1276_v45, %v1273_v44 }
 0x321   :  { %v1334_v49 = vpack.c.bf16 %v1277_v47, %v1274_v46  ;;  %v1011_v51 = vpop.f32.mrb[100].mxu0  ;;  %v3214_v46 = vld [vmem:[#allocation2 + $0x4c8] ss:$12 sps:$4 sm:$0xff]   ;;  %v3216_v47 = vld [vmem:[#allocation2 + $0x4cc] ss:$12 sps:$4 sm:$0xff]  }
 0x322   :  { %v1012_v52 = vadd.f32 %v1011_v51, %v3551_v37  ;;  %v1013_v53 = vpop.f32.mrb[101].mxu0  ;;  %2337 = vmatprep.subr.bf16.mxu0 %v3216_v47 }
 0x323   :  { %v1014_v55 = vadd.f32 %v1013_v53, %v3554_v38  ;;  %v1015_v56 = vpop.f32.mrb[102].mxu0  ;;  %1797 = vmatprep.mubr.bf16.mxu1 %v1334_v49  ;;  %2338 = vmatpush1.bf16.msra.mxu0 %v3214_v46 }
 0x324   :  { %v1016_v57 = vadd.f32 %v1015_v56, %v3551_v37  ;;  %v1017_v58 = vpop.f32.mrb[103].mxu0  ;;  %1798 = vmatmul.mubr.bf16.gmra.mrb[96].mxu1 %v1333_v48  ;;  %v1279_v3 = vmax.f32 %v1012_v52, 0.0 }
 0x325   :  { %v1018_v2 = vadd.f32 %v1017_v58, %v3554_v38  ;;  %v1280_v59 = vmax.f32 %v1014_v55, 0.0  ;;  %v3219_v58 = vld [vmem:[#allocation2 + $0x4e4] ss:$12 sps:$4 sm:$0xff]  }
 0x326   :  { %v1282_v5 = vmax.f32 %v1016_v57, 0.0  ;;  %v3217_v57 = vld [vmem:[#allocation2 + $0x4e0] ss:$12 sps:$4 sm:$0xff]   ;;  %2339 = vmatprep.subr.bf16.mxu0 %v3219_v58 }
 0x327   :  { %v1283_v7 = vmax.f32 %v1018_v2, 0.0  ;;  %2340 = vmatpush1.bf16.msra.mxu0 %v3217_v57  ;;  %v3228_v2 = vld [vmem:[#allocation2 + $0x52c] ss:$12 sps:$4 sm:$0xff]  }
 0x328   :  { %v1336_v8 = vpack.c.bf16 %v1282_v5, %v1279_v3  ;;  %v3226_v3 = vld [vmem:[#allocation2 + $0x528] ss:$12 sps:$4 sm:$0xff]   ;;  %v3231_v5 = vld [vmem:[#allocation2 + $0x544] ss:$12 sps:$4 sm:$0xff]  }
 0x329   :  { %v1337_v11 = vpack.c.bf16 %v1283_v7, %v1280_v59  ;;  %v1021_v12 = vpop.f32.mrb[104].mxu0  ;;  %v3229_v59 = vld [vmem:[#allocation2 + $0x540] ss:$12 sps:$4 sm:$0xff]   ;;  %v3234_v7 = vld [vmem:[#allocation2 + $0x55c] ss:$12 sps:$4 sm:$0xff]  }
 0x32a   :  { %v1022_v15 = vadd.f32 %v1021_v12, %v3551_v37  ;;  %v1023_v18 = vpop.f32.mrb[105].mxu0  ;;  %v3240_v12 = vld [vmem:[#allocation2 + $0x58c] ss:$12 sps:$4 sm:$0xff]  }
 0x32b   :  { %v1024_v39 = vadd.f32 %v1023_v18, %v3554_v38  ;;  %v1025_v20 = vpop.f32.mrb[106].mxu0  ;;  %1807 = vmatprep.mubr.bf16.mxu1 %v1337_v11  ;;  %v3235_v11 = vld [vmem:[#allocation2 + $0x570] ss:$12 sps:$4 sm:$0xff]   ;;  %v3241_v18 = vld [vmem:[#allocation2 + $0x5a0] ss:$12 sps:$4 sm:$0xff]  }
 0x32c   :  { %v1026_v21 = vadd.f32 %v1025_v20, %v3551_v37  ;;  %v1027_v22 = vpop.f32.mrb[107].mxu0  ;;  %1808 = vmatmul.mubr.bf16.gmra.mrb[100].mxu1 %v1336_v8  ;;  %v1285_v17 = vmax.f32 %v1022_v15, 0.0  ;;  %v3232_v8 = vld [vmem:[#allocation2 + $0x558] ss:$12 sps:$4 sm:$0xff]   ;;  %v3238_v15 = vld [vmem:[#allocation2 + $0x588] ss:$12 sps:$4 sm:$0xff]  }
 0x32d   :  { %v1028_v25 = vadd.f32 %v1027_v22, %v3554_v38  ;;  %v1286_v28 = vmax.f32 %v1024_v39, 0.0  ;;  %v3246_v39 = vld [vmem:[#allocation2 + $0x5bc] ss:$12 sps:$4 sm:$0xff]   ;;  %v3244_v20 = vld [vmem:[#allocation2 + $0x5b8] ss:$12 sps:$4 sm:$0xff]  }
 0x32e   :  { %v1288_v27 = vmax.f32 %v1026_v21, 0.0  ;;  %v3247_v21 = vld [vmem:[#allocation2 + $0x5d0] ss:$12 sps:$4 sm:$0xff]  }
 0x32f   :  { %v1289_v16 = vmax.f32 %v1028_v25, 0.0 }
 0x330   :  { %v1339_v29 = vpack.c.bf16 %v1288_v27, %v1285_v17 }
 0x331   :  { %v1340_v30 = vpack.c.bf16 %v1289_v16, %v1286_v28  ;;  %v1031_v32 = vpop.f32.mrb[108].mxu0 }
 0x332   :  { %v1032_v34 = vadd.f32 %v1031_v32, %v3551_v37  ;;  %v1033_v41 = vpop.f32.mrb[109].mxu0 }
 0x333   :  { %v1034_v42 = vadd.f32 %v1033_v41, %v3554_v38  ;;  %v1035_v43 = vpop.f32.mrb[110].mxu0  ;;  %1817 = vmatprep.mubr.bf16.mxu1 %v1340_v30 }
 0x334   :  { %v1036_v44 = vadd.f32 %v1035_v43, %v3551_v37  ;;  %v1037_v45 = vpop.f32.mrb[111].mxu0  ;;  %1818 = vmatmul.mubr.bf16.gmra.mrb[104].mxu1 %v1339_v29  ;;  %v1291_v49 = vmax.f32 %v1032_v34, 0.0  ;;  %v3222_v37 = vld [vmem:[#allocation2 + $0x4fc] ss:$12 sps:$4 sm:$0xff]  }
 0x335   :  { %v1038_v48 = vadd.f32 %v1037_v45, %v3554_v38  ;;  %v1292_v52 = vmax.f32 %v1034_v42, 0.0  ;;  %2341 = vmatprep.subr.bf16.mxu0 %v3222_v37  ;;  %v3225_v38 = vld [vmem:[#allocation2 + $0x514] ss:$12 sps:$4 sm:$0xff]  }
 0x336   :  { %v1294_v51 = vmax.f32 %v1036_v44, 0.0  ;;  %2342 = vmatpush1.bf16.msra.mxu0 %v3220_v61 }
 0x337   :  { %v1295_v53 = vmax.f32 %v1038_v48, 0.0  ;;  %2343 = vmatprep.subr.bf16.mxu0 %v3225_v38 }
 0x338   :  { %v1342_v55 = vpack.c.bf16 %v1294_v51, %v1291_v49 }
 0x339   :  { %v1343_v56 = vpack.c.bf16 %v1295_v53, %v1292_v52 }
 0x33a   :  { %2344 = vmatpush1.bf16.msra.mxu0 %v3223_v62 }
 0x33b   :  { %1827 = vmatprep.mubr.bf16.mxu1 %v1343_v56  ;;  %2345 = vmatprep.subr.bf16.mxu0 %v3228_v2 }
 0x33c   :  { %1828 = vmatmul.mubr.bf16.gmra.mrb[108].mxu1 %v1342_v55 }
 0x33d   :  { %1870 = vmatprep.mubr.bf16.mxu1 %v3280_v0 }
 0x33e   :  { %2346 = vmatpush1.bf16.msra.mxu0 %v3226_v3 }
 0x33f   :  { %2347 = vmatprep.subr.bf16.mxu0 %v3231_v5 }
 0x342   :  { %2348 = vmatpush1.bf16.msra.mxu0 %v3229_v59 }
 0x343   :  { %2349 = vmatprep.subr.bf16.mxu0 %v3234_v7 }
 0x344   :  { %1871 = vmatmul.mubr.bf16.vlgmr.msra.gmra.mrb[48].mxu1 %v3568_v6  ;;  %v3237_v6 = vld [vmem:[#allocation2 + $0x574] ss:$12 sps:$4 sm:$0xff]  }
 0x345   :  { %1880 = vmatprep.mubr.bf16.mxu1 %v3280_v0 }
 0x346   :  { %2350 = vmatpush1.bf16.msra.mxu0 %v3232_v8 }
 0x347   :  { %2351 = vmatprep.subr.bf16.mxu0 %v3237_v6 }
 0x34a   :  { %2352 = vmatpush1.bf16.msra.mxu0 %v3235_v11 }
 0x34b   :  { %2353 = vmatprep.subr.bf16.mxu0 %v3240_v12 }
 0x34c   :  { %1881 = vmatmul.mubr.bf16.gmra.mrb[52].mxu1 %v3566_v4  ;;  %v3243_v4 = vld [vmem:[#allocation2 + $0x5a4] ss:$12 sps:$4 sm:$0xff]  }
 0x34d   :  { %1890 = vmatprep.mubr.bf16.mxu1 %v3280_v0 }
 0x34e   :  { %2354 = vmatpush1.bf16.msra.mxu0 %v3238_v15 }
 0x34f   :  { %2355 = vmatprep.subr.bf16.mxu0 %v3243_v4 }
 0x352   :  { %2356 = vmatpush1.bf16.msra.mxu0 %v3241_v18 }
 0x353   :  { %2357 = vmatprep.subr.bf16.mxu0 %v3246_v39 }
 0x354   :  { %1891 = vmatmul.mubr.bf16.gmra.mrb[56].mxu1 %v3580_v63  ;;  %v3249_v63 = vld [vmem:[#allocation2 + $0x5d4] ss:$12 sps:$4 sm:$0xff]  }
 0x355   :  { %1900 = vmatprep.mubr.bf16.mxu1 %v3280_v0 }
 0x356   :  { %2358 = vmatpush1.bf16.msra.mxu0 %v3244_v20 }
 0x357   :  { %2359 = vmatprep.subr.bf16.mxu0 %v3249_v63 }
 0x35a   :  { %2360 = vmatpush1.bf16.msra.mxu0 %v3247_v21 }
 0x35c   :  { %1901 = vmatmul.mubr.bf16.gmra.mrb[60].mxu1 %v3578_v40  ;;  %v3252_v40 = vld [vmem:[#allocation2 + $0x5ec] ss:$12 sps:$4 sm:$0xff]  }
 0x35d   :  { %1910 = vmatprep.mubr.bf16.mxu1 %v3280_v0  ;;  %2361 = vmatprep.subr.bf16.mxu0 %v3252_v40 }
 0x364   :  { %1911 = vmatmul.mubr.bf16.gmra.mrb[64].mxu1 %v3593_v19  ;;  %v1393_v19 = vld [vmem:[%s4058_s2 + $0x5] sm:$0x3] }
 0x365   :  { %1920 = vmatprep.mubr.bf16.mxu1 %v3280_v0 }
 0x36c   :  { %1921 = vmatmul.mubr.bf16.gmra.mrb[68].mxu1 %v3590_v13  ;;  %v3250_v13 = vld [vmem:[#allocation2 + $0x5e8] ss:$12 sps:$4 sm:$0xff]  }
 0x36d   :  { %1930 = vmatprep.mubr.bf16.mxu1 %v3280_v0  ;;  %2362 = vmatpush1.bf16.msra.mxu0 %v3250_v13 }
 0x374   :  { %1931 = vmatmul.mubr.bf16.gmra.mrb[72].mxu1 %v3605_v54  ;;  %v3725_v54 = vrot.slane %v1393_v19, %v3548_v35 }
 0x375   :  { %1940 = vmatprep.mubr.bf16.mxu1 %v3280_v0 }
 0x37c   :  { %1941 = vmatmul.mubr.bf16.gmra.mrb[76].mxu1 %v3602_v50  ;;  %v3722_v50 = vrot.slane %v1393_v19, %v3543_v33 }
 0x37d   :  { %1950 = vmatprep.mubr.bf16.mxu1 %v3280_v0 }
 0x384   :  { %1951 = vmatmul.mubr.bf16.gmra.mrb[80].mxu1 %v3617_v10 }
 0x385   :  { %1960 = vmatprep.mubr.bf16.mxu1 %v3280_v0 }
 0x38c   :  { %1961 = vmatmul.mubr.bf16.gmra.mrb[84].mxu1 %v3614_v26 }
 0x38d   :  { %1970 = vmatprep.mubr.bf16.mxu1 %v3280_v0 }
 0x394   :  { %1971 = vmatmul.mubr.bf16.gmra.mrb[88].mxu1 %v3629_v1 }
 0x395   :  { %1980 = vmatprep.mubr.bf16.mxu1 %v3280_v0 }
 0x39c   :  { %1981 = vmatmul.mubr.bf16.gmra.mrb[92].mxu1 %v3626_v60 }
 0x39d   :  { %1990 = vmatprep.mubr.bf16.mxu1 %v3280_v0 }
 0x3a4   :  { %1991 = vmatmul.mubr.bf16.gmra.mrb[96].mxu1 %v3641_v36 }
 0x3a5   :  { %2000 = vmatprep.mubr.bf16.mxu1 %v3280_v0 }
 0x3ac   :  { %2001 = vmatmul.mubr.bf16.gmra.mrb[100].mxu1 %v3638_v31 }
 0x3ad   :  { %2010 = vmatprep.mubr.bf16.mxu1 %v3280_v0 }
 0x3b4   :  { %2011 = vmatmul.mubr.bf16.gmra.mrb[104].mxu1 %v3653_v14 }
 0x3b5   :  { %2020 = vmatprep.mubr.bf16.mxu1 %v3280_v0 }
 0x3bc   :  { %2021 = vmatmul.mubr.bf16.gmra.mrb[108].mxu1 %v3650_v9 }
 0x417   :  { %v1872_v26 = vpop.f32.mrb[48].mxu1 }
 0x418   :  { %v2955_v10 = vadd.f32 %v1872_v26, %v3722_v50  ;;  %v1874_v60 = vpop.f32.mrb[49].mxu1 }
 0x419   :  { %v2956_v1 = vadd.f32 %v1874_v60, %v3725_v54  ;;  %v1876_v31 = vpop.f32.mrb[50].mxu1 }
 0x41a   :  { %v2957_v0 = vadd.f32 %v1876_v31, %v3722_v50  ;;  %v1878_v36 = vpop.f32.mrb[51].mxu1  ;;  %v2031_v14 = vmax.f32 %v2955_v10, 0.0 }
 0x41b   :  { %v2958_v9 = vadd.f32 %v1878_v36, %v3725_v54  ;;  %v2032_v23 = vmax.f32 %v2956_v1, 0.0 }
 0x41c   :  { %v2033_v22 = vmax.f32 %v2957_v0, 0.0 }
 0x41d   :  { %v2034_v24 = vmax.f32 %v2958_v9, 0.0 }
 0x41e   :  { %v2095_v25 = vpack.c.bf16 %v2033_v22, %v2031_v14 }
 0x41f   :  { %v2096_v17 = vpack.c.bf16 %v2034_v24, %v2032_v23  ;;  %v1882_v27 = vpop.f32.mrb[52].mxu1 }
 0x420   :  { %v2959_v28 = vadd.f32 %v1882_v27, %v3722_v50  ;;  %v1884_v16 = vpop.f32.mrb[53].mxu1 }
 0x421   :  { %v2960_v29 = vadd.f32 %v1884_v16, %v3725_v54  ;;  %v1886_v30 = vpop.f32.mrb[54].mxu1  ;;  %2363 = vmatprep.mubr.bf16.mxu0 %v2096_v17 }
 0x422   :  { %v2961_v32 = vadd.f32 %v1886_v30, %v3722_v50  ;;  %v1888_v34 = vpop.f32.mrb[55].mxu1  ;;  %2364 = vmatmul.mubr.bf16.vlgmr.msra.gmra.mrb[112].mxu0 %v2095_v25  ;;  %v2035_v42 = vmax.f32 %v2959_v28, 0.0 }
 0x423   :  { %v2962_v41 = vadd.f32 %v1888_v34, %v3725_v54  ;;  %v2036_v44 = vmax.f32 %v2960_v29, 0.0 }
 0x424   :  { %v2037_v43 = vmax.f32 %v2961_v32, 0.0 }
 0x425   :  { %v2038_v45 = vmax.f32 %v2962_v41, 0.0 }
 0x426   :  { %v2097_v46 = vpack.c.bf16 %v2037_v43, %v2035_v42 }
 0x427   :  { %v2098_v47 = vpack.c.bf16 %v2038_v45, %v2036_v44  ;;  %v1892_v48 = vpop.f32.mrb[56].mxu1 }
 0x428   :  { %v2963_v49 = vadd.f32 %v1892_v48, %v3722_v50  ;;  %v1894_v51 = vpop.f32.mrb[57].mxu1 }
 0x429   :  { %v2964_v52 = vadd.f32 %v1894_v51, %v3725_v54  ;;  %v1896_v53 = vpop.f32.mrb[58].mxu1  ;;  %2373 = vmatprep.mubr.bf16.mxu0 %v2098_v47 }
 0x42a   :  { %v2965_v55 = vadd.f32 %v1896_v53, %v3722_v50  ;;  %v1898_v56 = vpop.f32.mrb[59].mxu1  ;;  %2374 = vmatmul.mubr.bf16.gmra.mrb[116].mxu0 %v2097_v46  ;;  %v2039_v58 = vmax.f32 %v2963_v49, 0.0 }
 0x42b   :  { %v2966_v57 = vadd.f32 %v1898_v56, %v3725_v54  ;;  %v2040_v61 = vmax.f32 %v2964_v52, 0.0 }
 0x42c   :  { %v2041_v37 = vmax.f32 %v2965_v55, 0.0 }
 0x42d   :  { %v2042_v38 = vmax.f32 %v2966_v57, 0.0 }
 0x42e   :  { %v2099_v62 = vpack.c.bf16 %v2041_v37, %v2039_v58 }
 0x42f   :  { %v2100_v2 = vpack.c.bf16 %v2042_v38, %v2040_v61  ;;  %v1902_v3 = vpop.f32.mrb[60].mxu1 }
 0x430   :  { %v2967_v5 = vadd.f32 %v1902_v3, %v3722_v50  ;;  %v1904_v59 = vpop.f32.mrb[61].mxu1 }
 0x431   :  { %v2968_v7 = vadd.f32 %v1904_v59, %v3725_v54  ;;  %v1906_v8 = vpop.f32.mrb[62].mxu1  ;;  %2383 = vmatprep.mubr.bf16.mxu0 %v2100_v2 }
 0x432   :  { %v2969_v6 = vadd.f32 %v1906_v8, %v3722_v50  ;;  %v1908_v11 = vpop.f32.mrb[63].mxu1  ;;  %2384 = vmatmul.mubr.bf16.gmra.mrb[120].mxu0 %v2099_v62  ;;  %v2043_v15 = vmax.f32 %v2967_v5, 0.0 }
 0x433   :  { %v2970_v12 = vadd.f32 %v1908_v11, %v3725_v54  ;;  %v2044_v18 = vmax.f32 %v2968_v7, 0.0 }
 0x434   :  { %v2045_v4 = vmax.f32 %v2969_v6, 0.0 }
 0x435   :  { %v2046_v39 = vmax.f32 %v2970_v12, 0.0 }
 0x436   :  { %v2101_v20 = vpack.c.bf16 %v2045_v4, %v2043_v15 }
 0x437   :  { %v2102_v63 = vpack.c.bf16 %v2046_v39, %v2044_v18  ;;  %v1912_v21 = vpop.f32.mrb[64].mxu1 }
 0x438   :  { %v2971_v40 = vadd.f32 %v1912_v21, %v3722_v50  ;;  %v1914_v13 = vpop.f32.mrb[65].mxu1 }
 0x439   :  { %v2972_v19 = vadd.f32 %v1914_v13, %v3725_v54  ;;  %v1916_v26 = vpop.f32.mrb[66].mxu1  ;;  %2393 = vmatprep.mubr.bf16.mxu0 %v2102_v63 }
 0x43a   :  { %v2973_v10 = vadd.f32 %v1916_v26, %v3722_v50  ;;  %v1918_v60 = vpop.f32.mrb[67].mxu1  ;;  %2394 = vmatmul.mubr.bf16.gmra.mrb[124].mxu0 %v2101_v20  ;;  %v2047_v31 = vmax.f32 %v2971_v40, 0.0 }
 0x43b   :  { %v2974_v1 = vadd.f32 %v1918_v60, %v3725_v54  ;;  %v2048_v36 = vmax.f32 %v2972_v19, 0.0 }
 0x43c   :  { %v2049_v0 = vmax.f32 %v2973_v10, 0.0 }
 0x43d   :  { %v2050_v9 = vmax.f32 %v2974_v1, 0.0 }
 0x43e   :  { %v2103_v14 = vpack.c.bf16 %v2049_v0, %v2047_v31 }
 0x43f   :  { %v2104_v22 = vpack.c.bf16 %v2050_v9, %v2048_v36  ;;  %v1922_v23 = vpop.f32.mrb[68].mxu1 }
 0x440   :  { %v2975_v24 = vadd.f32 %v1922_v23, %v3722_v50  ;;  %v1924_v25 = vpop.f32.mrb[69].mxu1 }
 0x441   :  { %v2976_v17 = vadd.f32 %v1924_v25, %v3725_v54  ;;  %v1926_v27 = vpop.f32.mrb[70].mxu1  ;;  %2403 = vmatprep.mubr.bf16.mxu0 %v2104_v22 }
 0x442   :  { %v2977_v28 = vadd.f32 %v1926_v27, %v3722_v50  ;;  %v1928_v16 = vpop.f32.mrb[71].mxu1  ;;  %2404 = vmatmul.mubr.bf16.gmra.mrb[128].mxu0 %v2103_v14  ;;  %v2051_v30 = vmax.f32 %v2975_v24, 0.0 }
 0x443   :  { %v2978_v29 = vadd.f32 %v1928_v16, %v3725_v54  ;;  %v2052_v34 = vmax.f32 %v2976_v17, 0.0 }
 0x444   :  { %v2053_v32 = vmax.f32 %v2977_v28, 0.0 }
 0x445   :  { %v2054_v41 = vmax.f32 %v2978_v29, 0.0 }
 0x446   :  { %v2105_v42 = vpack.c.bf16 %v2053_v32, %v2051_v30 }
 0x447   :  { %v2106_v43 = vpack.c.bf16 %v2054_v41, %v2052_v34  ;;  %v1932_v44 = vpop.f32.mrb[72].mxu1 }
 0x448   :  { %v2979_v45 = vadd.f32 %v1932_v44, %v3722_v50  ;;  %v1934_v46 = vpop.f32.mrb[73].mxu1 }
 0x449   :  { %v2980_v47 = vadd.f32 %v1934_v46, %v3725_v54  ;;  %v1936_v48 = vpop.f32.mrb[74].mxu1  ;;  %2413 = vmatprep.mubr.bf16.mxu0 %v2106_v43 }
 0x44a   :  { %v2981_v49 = vadd.f32 %v1936_v48, %v3722_v50  ;;  %v1938_v51 = vpop.f32.mrb[75].mxu1  ;;  %2414 = vmatmul.mubr.bf16.gmra.mrb[132].mxu0 %v2105_v42  ;;  %v2055_v53 = vmax.f32 %v2979_v45, 0.0 }
 0x44b   :  { %v2982_v52 = vadd.f32 %v1938_v51, %v3725_v54  ;;  %v2056_v56 = vmax.f32 %v2980_v47, 0.0 }
 0x44c   :  { %v2057_v55 = vmax.f32 %v2981_v49, 0.0 }
 0x44d   :  { %v2058_v57 = vmax.f32 %v2982_v52, 0.0 }
 0x44e   :  { %v2107_v58 = vpack.c.bf16 %v2057_v55, %v2055_v53 }
 0x44f   :  { %v2108_v37 = vpack.c.bf16 %v2058_v57, %v2056_v56  ;;  %v1942_v61 = vpop.f32.mrb[76].mxu1 }
 0x450   :  { %v2983_v38 = vadd.f32 %v1942_v61, %v3722_v50  ;;  %v1944_v62 = vpop.f32.mrb[77].mxu1 }
 0x451   :  { %v2984_v2 = vadd.f32 %v1944_v62, %v3725_v54  ;;  %v1946_v3 = vpop.f32.mrb[78].mxu1  ;;  %2423 = vmatprep.mubr.bf16.mxu0 %v2108_v37 }
 0x452   :  { %v2985_v5 = vadd.f32 %v1946_v3, %v3722_v50  ;;  %v1948_v59 = vpop.f32.mrb[79].mxu1  ;;  %2424 = vmatmul.mubr.bf16.gmra.mrb[136].mxu0 %v2107_v58  ;;  %v2059_v8 = vmax.f32 %v2983_v38, 0.0 }
 0x453   :  { %v2986_v7 = vadd.f32 %v1948_v59, %v3725_v54  ;;  %v2060_v11 = vmax.f32 %v2984_v2, 0.0 }
 0x454   :  { %v2061_v6 = vmax.f32 %v2985_v5, 0.0 }
 0x455   :  { %v2062_v12 = vmax.f32 %v2986_v7, 0.0 }
 0x456   :  { %v2109_v15 = vpack.c.bf16 %v2061_v6, %v2059_v8 }
 0x457   :  { %v2110_v4 = vpack.c.bf16 %v2062_v12, %v2060_v11  ;;  %v1952_v18 = vpop.f32.mrb[80].mxu1 }
 0x458   :  { %v2987_v39 = vadd.f32 %v1952_v18, %v3722_v50  ;;  %v1954_v20 = vpop.f32.mrb[81].mxu1 }
 0x459   :  { %v2988_v63 = vadd.f32 %v1954_v20, %v3725_v54  ;;  %v1956_v21 = vpop.f32.mrb[82].mxu1  ;;  %2433 = vmatprep.mubr.bf16.mxu0 %v2110_v4 }
 0x45a   :  { %v2989_v40 = vadd.f32 %v1956_v21, %v3722_v50  ;;  %v1958_v13 = vpop.f32.mrb[83].mxu1  ;;  %2434 = vmatmul.mubr.bf16.gmra.mrb[140].mxu0 %v2109_v15  ;;  %v2063_v26 = vmax.f32 %v2987_v39, 0.0 }
 0x45b   :  { %v2990_v19 = vadd.f32 %v1958_v13, %v3725_v54  ;;  %v2064_v60 = vmax.f32 %v2988_v63, 0.0 }
 0x45c   :  { %v2065_v10 = vmax.f32 %v2989_v40, 0.0 }
 0x45d   :  { %v2066_v1 = vmax.f32 %v2990_v19, 0.0 }
 0x45e   :  { %v2111_v31 = vpack.c.bf16 %v2065_v10, %v2063_v26 }
 0x45f   :  { %v2112_v0 = vpack.c.bf16 %v2066_v1, %v2064_v60  ;;  %v1962_v36 = vpop.f32.mrb[84].mxu1 }
 0x460   :  { %v2991_v9 = vadd.f32 %v1962_v36, %v3722_v50  ;;  %v1964_v14 = vpop.f32.mrb[85].mxu1 }
 0x461   :  { %v2992_v22 = vadd.f32 %v1964_v14, %v3725_v54  ;;  %v1966_v23 = vpop.f32.mrb[86].mxu1  ;;  %2443 = vmatprep.mubr.bf16.mxu0 %v2112_v0 }
 0x462   :  { %v2993_v24 = vadd.f32 %v1966_v23, %v3722_v50  ;;  %v1968_v25 = vpop.f32.mrb[87].mxu1  ;;  %2444 = vmatmul.mubr.bf16.gmra.mrb[144].mxu0 %v2111_v31  ;;  %v2067_v27 = vmax.f32 %v2991_v9, 0.0 }
 0x463   :  { %v2994_v17 = vadd.f32 %v1968_v25, %v3725_v54  ;;  %v2068_v16 = vmax.f32 %v2992_v22, 0.0 }
 0x464   :  { %v2069_v28 = vmax.f32 %v2993_v24, 0.0 }
 0x465   :  { %v2070_v29 = vmax.f32 %v2994_v17, 0.0 }
 0x466   :  { %v2113_v30 = vpack.c.bf16 %v2069_v28, %v2067_v27 }
 0x467   :  { %v2114_v32 = vpack.c.bf16 %v2070_v29, %v2068_v16  ;;  %v1972_v34 = vpop.f32.mrb[88].mxu1 }
 0x468   :  { %v2995_v41 = vadd.f32 %v1972_v34, %v3722_v50  ;;  %v1974_v42 = vpop.f32.mrb[89].mxu1 }
 0x469   :  { %v2996_v43 = vadd.f32 %v1974_v42, %v3725_v54  ;;  %v1976_v44 = vpop.f32.mrb[90].mxu1  ;;  %2453 = vmatprep.mubr.bf16.mxu0 %v2114_v32 }
 0x46a   :  { %v2997_v45 = vadd.f32 %v1976_v44, %v3722_v50  ;;  %v1978_v46 = vpop.f32.mrb[91].mxu1  ;;  %2454 = vmatmul.mubr.bf16.gmra.mrb[148].mxu0 %v2113_v30  ;;  %v2071_v48 = vmax.f32 %v2995_v41, 0.0 }
 0x46b   :  { %v2998_v47 = vadd.f32 %v1978_v46, %v3725_v54  ;;  %v2072_v51 = vmax.f32 %v2996_v43, 0.0 }
 0x46c   :  { %v2073_v49 = vmax.f32 %v2997_v45, 0.0 }
 0x46d   :  { %v2074_v52 = vmax.f32 %v2998_v47, 0.0 }
 0x46e   :  { %v2115_v53 = vpack.c.bf16 %v2073_v49, %v2071_v48 }
 0x46f   :  { %v2116_v55 = vpack.c.bf16 %v2074_v52, %v2072_v51  ;;  %v1982_v56 = vpop.f32.mrb[92].mxu1 }
 0x470   :  { %v2999_v57 = vadd.f32 %v1982_v56, %v3722_v50  ;;  %v1984_v58 = vpop.f32.mrb[93].mxu1 }
 0x471   :  { %v3000_v37 = vadd.f32 %v1984_v58, %v3725_v54  ;;  %v1986_v61 = vpop.f32.mrb[94].mxu1  ;;  %2463 = vmatprep.mubr.bf16.mxu0 %v2116_v55 }
 0x472   :  { %v3001_v38 = vadd.f32 %v1986_v61, %v3722_v50  ;;  %v1988_v62 = vpop.f32.mrb[95].mxu1  ;;  %2464 = vmatmul.mubr.bf16.gmra.mrb[152].mxu0 %v2115_v53  ;;  %v2075_v3 = vmax.f32 %v2999_v57, 0.0 }
 0x473   :  { %v3002_v2 = vadd.f32 %v1988_v62, %v3725_v54  ;;  %v2076_v59 = vmax.f32 %v3000_v37, 0.0 }
 0x474   :  { %v2077_v5 = vmax.f32 %v3001_v38, 0.0 }
 0x475   :  { %v2078_v7 = vmax.f32 %v3002_v2, 0.0 }
 0x476   :  { %v2117_v8 = vpack.c.bf16 %v2077_v5, %v2075_v3 }
 0x477   :  { %v2118_v6 = vpack.c.bf16 %v2078_v7, %v2076_v59  ;;  %v1992_v11 = vpop.f32.mrb[96].mxu1  ;;  %v2159_v59 = vld [vmem:[%s4058_s2 + $0x7] sm:$0x3] }
 0x478   :  { %v3003_v12 = vadd.f32 %v1992_v11, %v3722_v50  ;;  %v1994_v15 = vpop.f32.mrb[97].mxu1  ;;  %v3795_v7 = vrot.slane %v2159_v59, %v3543_v33 }
 0x479   :  { %v3004_v4 = vadd.f32 %v1994_v15, %v3725_v54  ;;  %v1996_v18 = vpop.f32.mrb[98].mxu1  ;;  %2473 = vmatprep.mubr.bf16.mxu0 %v2118_v6 }
 0x47a   :  { %v3005_v39 = vadd.f32 %v1996_v18, %v3722_v50  ;;  %v1998_v20 = vpop.f32.mrb[99].mxu1  ;;  %2474 = vmatmul.mubr.bf16.gmra.mrb[156].mxu0 %v2117_v8  ;;  %v2079_v21 = vmax.f32 %v3003_v12, 0.0 }
 0x47b   :  { %v3006_v63 = vadd.f32 %v1998_v20, %v3725_v54  ;;  %v2080_v13 = vmax.f32 %v3004_v4, 0.0 }
 0x47c   :  { %v2081_v40 = vmax.f32 %v3005_v39, 0.0 }
 0x47d   :  { %v2082_v19 = vmax.f32 %v3006_v63, 0.0 }
 0x47e   :  { %v2119_v26 = vpack.c.bf16 %v2081_v40, %v2079_v21 }
 0x47f   :  { %v2120_v10 = vpack.c.bf16 %v2082_v19, %v2080_v13  ;;  %v2002_v60 = vpop.f32.mrb[100].mxu1 }
 0x480   :  { %v3007_v1 = vadd.f32 %v2002_v60, %v3722_v50  ;;  %v2004_v31 = vpop.f32.mrb[101].mxu1 }
 0x481   :  { %v3008_v0 = vadd.f32 %v2004_v31, %v3725_v54  ;;  %v2006_v36 = vpop.f32.mrb[102].mxu1  ;;  %2483 = vmatprep.mubr.bf16.mxu0 %v2120_v10 }
 0x482   :  { %v3009_v9 = vadd.f32 %v2006_v36, %v3722_v50  ;;  %v2008_v14 = vpop.f32.mrb[103].mxu1  ;;  %2484 = vmatmul.mubr.bf16.gmra.mrb[160].mxu0 %v2119_v26  ;;  %v2083_v23 = vmax.f32 %v3007_v1, 0.0 }
 0x483   :  { %v3010_v22 = vadd.f32 %v2008_v14, %v3725_v54  ;;  %v2084_v25 = vmax.f32 %v3008_v0, 0.0 }
 0x484   :  { %v2085_v24 = vmax.f32 %v3009_v9, 0.0 }
 0x485   :  { %v2086_v17 = vmax.f32 %v3010_v22, 0.0 }
 0x486   :  { %v2121_v27 = vpack.c.bf16 %v2085_v24, %v2083_v23 }
 0x487   :  { %v2122_v28 = vpack.c.bf16 %v2086_v17, %v2084_v25  ;;  %v2012_v16 = vpop.f32.mrb[104].mxu1 }
 0x488   :  { %v3011_v29 = vadd.f32 %v2012_v16, %v3722_v50  ;;  %v2014_v30 = vpop.f32.mrb[105].mxu1 }
 0x489   :  { %v3012_v32 = vadd.f32 %v2014_v30, %v3725_v54  ;;  %v2016_v34 = vpop.f32.mrb[106].mxu1  ;;  %2493 = vmatprep.mubr.bf16.mxu0 %v2122_v28 }
 0x48a   :  { %v3013_v41 = vadd.f32 %v2016_v34, %v3722_v50  ;;  %v2018_v42 = vpop.f32.mrb[107].mxu1  ;;  %2494 = vmatmul.mubr.bf16.gmra.mrb[164].mxu0 %v2121_v27  ;;  %v2087_v44 = vmax.f32 %v3011_v29, 0.0 }
 0x48b   :  { %v3014_v43 = vadd.f32 %v2018_v42, %v3725_v54  ;;  %v2088_v46 = vmax.f32 %v3012_v32, 0.0 }
 0x48c   :  { %v2089_v45 = vmax.f32 %v3013_v41, 0.0 }
 0x48d   :  { %v2090_v47 = vmax.f32 %v3014_v43, 0.0 }
 0x48e   :  { %v2123_v48 = vpack.c.bf16 %v2089_v45, %v2087_v44 }
 0x48f   :  { %v2124_v49 = vpack.c.bf16 %v2090_v47, %v2088_v46  ;;  %v2022_v51 = vpop.f32.mrb[108].mxu1 }
 0x490   :  { %v3015_v52 = vadd.f32 %v2022_v51, %v3722_v50  ;;  %v2024_v53 = vpop.f32.mrb[109].mxu1 }
 0x491   :  { %v3016_v55 = vadd.f32 %v2024_v53, %v3725_v54  ;;  %v2026_v56 = vpop.f32.mrb[110].mxu1  ;;  %2503 = vmatprep.mubr.bf16.mxu0 %v2124_v49 }
 0x492   :  { %v3017_v57 = vadd.f32 %v2026_v56, %v3722_v50  ;;  %v2028_v58 = vpop.f32.mrb[111].mxu1  ;;  %2504 = vmatmul.mubr.bf16.gmra.mrb[168].mxu0 %v2123_v48  ;;  %v2091_v61 = vmax.f32 %v3015_v52, 0.0  ;;  %v3798_v50 = vrot.slane %v2159_v59, %v3548_v35 }
 0x493   :  { %v3018_v37 = vadd.f32 %v2028_v58, %v3725_v54  ;;  %v2092_v62 = vmax.f32 %v3016_v55, 0.0 }
 0x494   :  { %v2093_v38 = vmax.f32 %v3017_v57, 0.0 }
 0x495   :  { %v2094_v2 = vmax.f32 %v3018_v37, 0.0 }
 0x496   :  { %v2125_v3 = vpack.c.bf16 %v2093_v38, %v2091_v61 }
 0x497   :  { %v2126_v5 = vpack.c.bf16 %v2094_v2, %v2092_v62 }
 0x499   :  { %2513 = vmatprep.mubr.bf16.mxu0 %v2126_v5 }
 0x49a   :  { %2514 = vmatmul.mubr.bf16.gmra.mrb[172].mxu0 %v2125_v3 }
 0x4f5   :  { %v2365_v8 = vpop.f32.mrb[112].mxu0 }
 0x4f6   :  { %v2366_v54 = vadd.f32 %v2365_v8, %v3795_v7  ;;  %v2367_v6 = vpop.f32.mrb[113].mxu0 }
 0x4f7   :  { %v2368_v11 = vadd.f32 %v2367_v6, %v3798_v50  ;;  %v2369_v12 = vpop.f32.mrb[114].mxu0 }
 0x4f8   :  { %2524 = vst [vmem:[%s4059_s3] sm:$0xff] %v2366_v54  ;;  %v2370_v15 = vadd.f32 %v2369_v12, %v3795_v7  ;;  %v2371_v4 = vpop.f32.mrb[115].mxu0 }
 0x4f9   :  { %2525 = vst [vmem:[%s4059_s3 + $0x8] sm:$0xff] %v2368_v11  ;;  %v2372_v33 = vadd.f32 %v2371_v4, %v3798_v50 }
 0x4fa   :  { %2526 = vst [vmem:[%s4059_s3 + $0x10] sm:$0xff] %v2370_v15 }
 0x4fb   :  { %2527 = vst [vmem:[%s4059_s3 + $0x18] sm:$0xff] %v2372_v33 }
 0x4fd   :  { %v2375_v35 = vpop.f32.mrb[116].mxu0 }
 0x4fe   :  { %v2376_v18 = vadd.f32 %v2375_v35, %v3795_v7  ;;  %v2377_v39 = vpop.f32.mrb[117].mxu0 }
 0x4ff   :  { %v2378_v20 = vadd.f32 %v2377_v39, %v3798_v50  ;;  %v2379_v63 = vpop.f32.mrb[118].mxu0 }
 0x500   :  { %2528 = vst [vmem:[%s4059_s3 + $0x20] sm:$0xff] %v2376_v18  ;;  %v2380_v21 = vadd.f32 %v2379_v63, %v3795_v7  ;;  %v2381_v40 = vpop.f32.mrb[119].mxu0 }
 0x501   :  { %2529 = vst [vmem:[%s4059_s3 + $0x28] sm:$0xff] %v2378_v20  ;;  %v2382_v13 = vadd.f32 %v2381_v40, %v3798_v50 }
 0x502   :  { %2530 = vst [vmem:[%s4059_s3 + $0x30] sm:$0xff] %v2380_v21 }
 0x503   :  { %2531 = vst [vmem:[%s4059_s3 + $0x38] sm:$0xff] %v2382_v13 }
 0x505   :  { %v2385_v19 = vpop.f32.mrb[120].mxu0 }
 0x506   :  { %v2386_v26 = vadd.f32 %v2385_v19, %v3795_v7  ;;  %v2387_v10 = vpop.f32.mrb[121].mxu0 }
 0x507   :  { %v2388_v60 = vadd.f32 %v2387_v10, %v3798_v50  ;;  %v2389_v1 = vpop.f32.mrb[122].mxu0 }
 0x508   :  { %2532 = vst [vmem:[%s4059_s3 + $0x40] sm:$0xff] %v2386_v26  ;;  %v2390_v31 = vadd.f32 %v2389_v1, %v3795_v7  ;;  %v2391_v0 = vpop.f32.mrb[123].mxu0 }
 0x509   :  { %2533 = vst [vmem:[%s4059_s3 + $0x48] sm:$0xff] %v2388_v60  ;;  %v2392_v36 = vadd.f32 %v2391_v0, %v3798_v50 }
 0x50a   :  { %2534 = vst [vmem:[%s4059_s3 + $0x50] sm:$0xff] %v2390_v31 }
 0x50b   :  { %2535 = vst [vmem:[%s4059_s3 + $0x58] sm:$0xff] %v2392_v36 }
 0x50d   :  { %v2395_v9 = vpop.f32.mrb[124].mxu0 }
 0x50e   :  { %v2396_v14 = vadd.f32 %v2395_v9, %v3795_v7  ;;  %v2397_v22 = vpop.f32.mrb[125].mxu0 }
 0x50f   :  { %v2398_v23 = vadd.f32 %v2397_v22, %v3798_v50  ;;  %v2399_v24 = vpop.f32.mrb[126].mxu0 }
 0x510   :  { %2536 = vst [vmem:[%s4059_s3 + $0x60] sm:$0xff] %v2396_v14  ;;  %v2400_v25 = vadd.f32 %v2399_v24, %v3795_v7  ;;  %v2401_v17 = vpop.f32.mrb[127].mxu0 }
 0x511   :  { %2537 = vst [vmem:[%s4059_s3 + $0x68] sm:$0xff] %v2398_v23  ;;  %v2402_v27 = vadd.f32 %v2401_v17, %v3798_v50 }
 0x512   :  { %2538 = vst [vmem:[%s4059_s3 + $0x70] sm:$0xff] %v2400_v25 }
 0x513   :  { %2539 = vst [vmem:[%s4059_s3 + $0x78] sm:$0xff] %v2402_v27 }
 0x515   :  { %v2405_v28 = vpop.f32.mrb[128].mxu0 }
 0x516   :  { %v2406_v16 = vadd.f32 %v2405_v28, %v3795_v7  ;;  %v2407_v29 = vpop.f32.mrb[129].mxu0 }
 0x517   :  { %v2408_v30 = vadd.f32 %v2407_v29, %v3798_v50  ;;  %v2409_v32 = vpop.f32.mrb[130].mxu0 }
 0x518   :  { %2540 = vst [vmem:[%s4059_s3 + $0x80] sm:$0xff] %v2406_v16  ;;  %v2410_v34 = vadd.f32 %v2409_v32, %v3795_v7  ;;  %v2411_v41 = vpop.f32.mrb[131].mxu0 }
 0x519   :  { %2541 = vst [vmem:[%s4059_s3 + $0x88] sm:$0xff] %v2408_v30  ;;  %v2412_v42 = vadd.f32 %v2411_v41, %v3798_v50 }
 0x51a   :  { %2542 = vst [vmem:[%s4059_s3 + $0x90] sm:$0xff] %v2410_v34 }
 0x51b   :  { %2543 = vst [vmem:[%s4059_s3 + $0x98] sm:$0xff] %v2412_v42 }
 0x51d   :  { %v2415_v43 = vpop.f32.mrb[132].mxu0 }
 0x51e   :  { %v2416_v44 = vadd.f32 %v2415_v43, %v3795_v7  ;;  %v2417_v45 = vpop.f32.mrb[133].mxu0 }
 0x51f   :  { %v2418_v46 = vadd.f32 %v2417_v45, %v3798_v50  ;;  %v2419_v47 = vpop.f32.mrb[134].mxu0 }
 0x520   :  { %2544 = vst [vmem:[%s4059_s3 + $0xa0] sm:$0xff] %v2416_v44  ;;  %v2420_v48 = vadd.f32 %v2419_v47, %v3795_v7  ;;  %v2421_v49 = vpop.f32.mrb[135].mxu0 }
 0x521   :  { %2545 = vst [vmem:[%s4059_s3 + $0xa8] sm:$0xff] %v2418_v46  ;;  %v2422_v51 = vadd.f32 %v2421_v49, %v3798_v50 }
 0x522   :  { %2546 = vst [vmem:[%s4059_s3 + $0xb0] sm:$0xff] %v2420_v48 }
 0x523   :  { %2547 = vst [vmem:[%s4059_s3 + $0xb8] sm:$0xff] %v2422_v51 }
 0x525   :  { %v2425_v52 = vpop.f32.mrb[136].mxu0 }
 0x526   :  { %v2426_v53 = vadd.f32 %v2425_v52, %v3795_v7  ;;  %v2427_v55 = vpop.f32.mrb[137].mxu0 }
 0x527   :  { %v2428_v56 = vadd.f32 %v2427_v55, %v3798_v50  ;;  %v2429_v57 = vpop.f32.mrb[138].mxu0 }
 0x528   :  { %2548 = vst [vmem:[%s4059_s3 + $0xc0] sm:$0xff] %v2426_v53  ;;  %v2430_v58 = vadd.f32 %v2429_v57, %v3795_v7  ;;  %v2431_v37 = vpop.f32.mrb[139].mxu0 }
 0x529   :  { %2549 = vst [vmem:[%s4059_s3 + $0xc8] sm:$0xff] %v2428_v56  ;;  %v2432_v61 = vadd.f32 %v2431_v37, %v3798_v50 }
 0x52a   :  { %2550 = vst [vmem:[%s4059_s3 + $0xd0] sm:$0xff] %v2430_v58 }
 0x52b   :  { %2551 = vst [vmem:[%s4059_s3 + $0xd8] sm:$0xff] %v2432_v61 }
 0x52d   :  { %v2435_v38 = vpop.f32.mrb[140].mxu0 }
 0x52e   :  { %v2436_v62 = vadd.f32 %v2435_v38, %v3795_v7  ;;  %v2437_v2 = vpop.f32.mrb[141].mxu0 }
 0x52f   :  { %v2438_v3 = vadd.f32 %v2437_v2, %v3798_v50  ;;  %v2439_v5 = vpop.f32.mrb[142].mxu0 }
 0x530   :  { %2552 = vst [vmem:[%s4059_s3 + $0xe0] sm:$0xff] %v2436_v62  ;;  %v2440_v59 = vadd.f32 %v2439_v5, %v3795_v7  ;;  %v2441_v8 = vpop.f32.mrb[143].mxu0 }
 0x531   :  { %2553 = vst [vmem:[%s4059_s3 + $0xe8] sm:$0xff] %v2438_v3  ;;  %v2442_v54 = vadd.f32 %v2441_v8, %v3798_v50 }
 0x532   :  { %2554 = vst [vmem:[%s4059_s3 + $0xf0] sm:$0xff] %v2440_v59 }
 0x533   :  { %2555 = vst [vmem:[%s4059_s3 + $0xf8] sm:$0xff] %v2442_v54 }
 0x535   :  { %v2445_v6 = vpop.f32.mrb[144].mxu0 }
 0x536   :  { %v2446_v11 = vadd.f32 %v2445_v6, %v3795_v7  ;;  %v2447_v12 = vpop.f32.mrb[145].mxu0 }
 0x537   :  { %v2448_v15 = vadd.f32 %v2447_v12, %v3798_v50  ;;  %v2449_v4 = vpop.f32.mrb[146].mxu0 }
 0x538   :  { %2556 = vst [vmem:[%s4059_s3 + $0x100] sm:$0xff] %v2446_v11  ;;  %v2450_v33 = vadd.f32 %v2449_v4, %v3795_v7  ;;  %v2451_v35 = vpop.f32.mrb[147].mxu0 }
 0x539   :  { %2557 = vst [vmem:[%s4059_s3 + $0x108] sm:$0xff] %v2448_v15  ;;  %v2452_v18 = vadd.f32 %v2451_v35, %v3798_v50 }
 0x53a   :  { %2558 = vst [vmem:[%s4059_s3 + $0x110] sm:$0xff] %v2450_v33 }
 0x53b   :  { %2559 = vst [vmem:[%s4059_s3 + $0x118] sm:$0xff] %v2452_v18 }
 0x53d   :  { %v2455_v39 = vpop.f32.mrb[148].mxu0 }
 0x53e   :  { %v2456_v20 = vadd.f32 %v2455_v39, %v3795_v7  ;;  %v2457_v63 = vpop.f32.mrb[149].mxu0 }
 0x53f   :  { %v2458_v21 = vadd.f32 %v2457_v63, %v3798_v50  ;;  %v2459_v40 = vpop.f32.mrb[150].mxu0 }
 0x540   :  { %2560 = vst [vmem:[%s4059_s3 + $0x120] sm:$0xff] %v2456_v20  ;;  %v2460_v13 = vadd.f32 %v2459_v40, %v3795_v7  ;;  %v2461_v19 = vpop.f32.mrb[151].mxu0 }
 0x541   :  { %2561 = vst [vmem:[%s4059_s3 + $0x128] sm:$0xff] %v2458_v21  ;;  %v2462_v26 = vadd.f32 %v2461_v19, %v3798_v50 }
 0x542   :  { %2562 = vst [vmem:[%s4059_s3 + $0x130] sm:$0xff] %v2460_v13 }
 0x543   :  { %2563 = vst [vmem:[%s4059_s3 + $0x138] sm:$0xff] %v2462_v26 }
 0x545   :  { %v2465_v10 = vpop.f32.mrb[152].mxu0 }
 0x546   :  { %v2466_v60 = vadd.f32 %v2465_v10, %v3795_v7  ;;  %v2467_v1 = vpop.f32.mrb[153].mxu0 }
 0x547   :  { %v2468_v31 = vadd.f32 %v2467_v1, %v3798_v50  ;;  %v2469_v0 = vpop.f32.mrb[154].mxu0 }
 0x548   :  { %2564 = vst [vmem:[%s4059_s3 + $0x140] sm:$0xff] %v2466_v60  ;;  %v2470_v36 = vadd.f32 %v2469_v0, %v3795_v7  ;;  %v2471_v9 = vpop.f32.mrb[155].mxu0 }
 0x549   :  { %2565 = vst [vmem:[%s4059_s3 + $0x148] sm:$0xff] %v2468_v31  ;;  %v2472_v14 = vadd.f32 %v2471_v9, %v3798_v50 }
 0x54a   :  { %2566 = vst [vmem:[%s4059_s3 + $0x150] sm:$0xff] %v2470_v36 }
 0x54b   :  { %2567 = vst [vmem:[%s4059_s3 + $0x158] sm:$0xff] %v2472_v14 }
 0x54d   :  { %v2475_v22 = vpop.f32.mrb[156].mxu0 }
 0x54e   :  { %v2476_v23 = vadd.f32 %v2475_v22, %v3795_v7  ;;  %v2477_v24 = vpop.f32.mrb[157].mxu0 }
 0x54f   :  { %v2478_v25 = vadd.f32 %v2477_v24, %v3798_v50  ;;  %v2479_v17 = vpop.f32.mrb[158].mxu0 }
 0x550   :  { %2568 = vst [vmem:[%s4059_s3 + $0x160] sm:$0xff] %v2476_v23  ;;  %v2480_v27 = vadd.f32 %v2479_v17, %v3795_v7  ;;  %v2481_v28 = vpop.f32.mrb[159].mxu0 }
 0x551   :  { %2569 = vst [vmem:[%s4059_s3 + $0x168] sm:$0xff] %v2478_v25  ;;  %v2482_v16 = vadd.f32 %v2481_v28, %v3798_v50 }
 0x552   :  { %2570 = vst [vmem:[%s4059_s3 + $0x170] sm:$0xff] %v2480_v27 }
 0x553   :  { %2571 = vst [vmem:[%s4059_s3 + $0x178] sm:$0xff] %v2482_v16 }
 0x555   :  { %v2485_v29 = vpop.f32.mrb[160].mxu0 }
 0x556   :  { %v2486_v30 = vadd.f32 %v2485_v29, %v3795_v7  ;;  %v2487_v32 = vpop.f32.mrb[161].mxu0 }
 0x557   :  { %v2488_v34 = vadd.f32 %v2487_v32, %v3798_v50  ;;  %v2489_v41 = vpop.f32.mrb[162].mxu0 }
 0x558   :  { %2572 = vst [vmem:[%s4059_s3 + $0x180] sm:$0xff] %v2486_v30  ;;  %v2490_v42 = vadd.f32 %v2489_v41, %v3795_v7  ;;  %v2491_v43 = vpop.f32.mrb[163].mxu0 }
 0x559   :  { %2573 = vst [vmem:[%s4059_s3 + $0x188] sm:$0xff] %v2488_v34  ;;  %v2492_v44 = vadd.f32 %v2491_v43, %v3798_v50 }
 0x55a   :  { %2574 = vst [vmem:[%s4059_s3 + $0x190] sm:$0xff] %v2490_v42 }
 0x55b   :  { %2575 = vst [vmem:[%s4059_s3 + $0x198] sm:$0xff] %v2492_v44 }
 0x55d   :  { %v2495_v45 = vpop.f32.mrb[164].mxu0 }
 0x55e   :  { %v2496_v46 = vadd.f32 %v2495_v45, %v3795_v7  ;;  %v2497_v47 = vpop.f32.mrb[165].mxu0 }
 0x55f   :  { %v2498_v48 = vadd.f32 %v2497_v47, %v3798_v50  ;;  %v2499_v49 = vpop.f32.mrb[166].mxu0 }
 0x560   :  { %2576 = vst [vmem:[%s4059_s3 + $0x1a0] sm:$0xff] %v2496_v46  ;;  %v2500_v51 = vadd.f32 %v2499_v49, %v3795_v7  ;;  %v2501_v52 = vpop.f32.mrb[167].mxu0 }
 0x561   :  { %2577 = vst [vmem:[%s4059_s3 + $0x1a8] sm:$0xff] %v2498_v48  ;;  %v2502_v53 = vadd.f32 %v2501_v52, %v3798_v50 }
 0x562   :  { %2578 = vst [vmem:[%s4059_s3 + $0x1b0] sm:$0xff] %v2500_v51 }
 0x563   :  { %2579 = vst [vmem:[%s4059_s3 + $0x1b8] sm:$0xff] %v2502_v53 }
 0x565   :  { %v2505_v55 = vpop.f32.mrb[168].mxu0 }
 0x566   :  { %v2506_v56 = vadd.f32 %v2505_v55, %v3795_v7  ;;  %v2507_v57 = vpop.f32.mrb[169].mxu0 }
 0x567   :  { %v2508_v58 = vadd.f32 %v2507_v57, %v3798_v50  ;;  %v2509_v37 = vpop.f32.mrb[170].mxu0 }
 0x568   :  { %2580 = vst [vmem:[%s4059_s3 + $0x1c0] sm:$0xff] %v2506_v56  ;;  %v2510_v61 = vadd.f32 %v2509_v37, %v3795_v7  ;;  %v2511_v38 = vpop.f32.mrb[171].mxu0 }
 0x569   :  { %2581 = vst [vmem:[%s4059_s3 + $0x1c8] sm:$0xff] %v2508_v58  ;;  %v2512_v62 = vadd.f32 %v2511_v38, %v3798_v50 }
 0x56a   :  { %2582 = vst [vmem:[%s4059_s3 + $0x1d0] sm:$0xff] %v2510_v61 }
 0x56b   :  { %2583 = vst [vmem:[%s4059_s3 + $0x1d8] sm:$0xff] %v2512_v62 }
 0x56d   :  { %v2515_v2 = vpop.f32.mrb[172].mxu0 }
 0x56e   :  { %v2516_v3 = vadd.f32 %v2515_v2, %v3795_v7  ;;  %v2517_v5 = vpop.f32.mrb[173].mxu0 }
 0x56f   :  { %v2518_v59 = vadd.f32 %v2517_v5, %v3798_v50  ;;  %v2519_v8 = vpop.f32.mrb[174].mxu0 }
 0x570   :  { %2584 = vst [vmem:[%s4059_s3 + $0x1e0] sm:$0xff] %v2516_v3  ;;  %v2520_v54 = vadd.f32 %v2519_v8, %v3795_v7  ;;  %v2521_v6 = vpop.f32.mrb[175].mxu0 }
 0x571   :  { %2585 = vst [vmem:[%s4059_s3 + $0x1e8] sm:$0xff] %v2518_v59  ;;  %v2522_v11 = vadd.f32 %v2521_v6, %v3798_v50 }
 0x572   :  { %2586 = vst [vmem:[%s4059_s3 + $0x1f0] sm:$0xff] %v2520_v54 }
 0x573   :  { %2587 = vst [vmem:[%s4059_s3 + $0x1f8] sm:$0xff] %v2522_v11 }
 0x574   :  { %2592 = vsyncpa [#allocation3], 1 }

</bundles_post_ra>
